<compile_context>
chip_gen: v5e
topology: v5e:2x2
jax: 0.10.0
libtpu: 0.0.40
codegen_flags: <defaults>
</compile_context>

<pallas_src>
import functools
import math

import jax
import jax.numpy as jnp
from jax.experimental import pallas as pl
from jax.experimental.pallas import tpu as pltpu


_SUBLANE = 8
_LANE = 128


def _round_up(x, m):
    return ((x + m - 1) // m) * m


def _choose_tile(dim, mult, cap):
    """Return (tile, padded_dim): tile is a multiple of `mult`, padded_dim a multiple of tile."""
    r = _round_up(dim, mult)
    if r <= cap:
        return r, r
    return cap, _round_up(dim, cap)


# -----------------------------------------------------------------------------
# Tiled fused matmul + bias (+ optional ReLU)
# -----------------------------------------------------------------------------
def _matmul_bias_kernel(a_ref, b_ref, bias_ref, o_ref, acc_ref, *, activation):
    @pl.when(pl.program_id(2) == 0)
    def _():
        acc_ref[...] = jnp.zeros_like(acc_ref)

    acc_ref[...] += jnp.dot(a_ref[...], b_ref[...],
                            preferred_element_type=jnp.float32)

    @pl.when(pl.program_id(2) == pl.num_programs(2) - 1)
    def _():
        out = acc_ref[...] + bias_ref[...]
        if activation == "relu":
            out = jnp.maximum(out, 0.0)
        o_ref[...] = out


def pallas_linear(a, w, b, *, activation=None):
    """a: [M, K], w: [K, N] (bf16 ok), b: [N] -> [M, N] float32."""
    M, K = a.shape
    K2, N = w.shape
    assert K == K2

    tm, Mp = _choose_tile(M, _SUBLANE, 256)
    tn, Np = _choose_tile(N, _LANE, 256)
    tk, Kp = _choose_tile(K, _LANE, 512)

    a_p = a.astype(jnp.bfloat16)
    if (Mp, Kp) != (M, K):
        a_p = jnp.pad(a_p, ((0, Mp - M), (0, Kp - K)))
    w_p = w.astype(jnp.bfloat16)
    if (Kp, Np) != (K, N):
        w_p = jnp.pad(w_p, ((0, Kp - K), (0, Np - N)))
    b_p = b.astype(jnp.float32).reshape(1, N)
    if Np != N:
        b_p = jnp.pad(b_p, ((0, 0), (0, Np - N)))

    kern = functools.partial(_matmul_bias_kernel, activation=activation)
    out = pl.pallas_call(
        kern,
        out_shape=jax.ShapeDtypeStruct((Mp, Np), jnp.float32),
        grid_spec=pltpu.PrefetchScalarGridSpec(
            num_scalar_prefetch=0,
            grid=(Mp // tm, Np // tn, Kp // tk),
            in_specs=[
                pl.BlockSpec((tm, tk), lambda i, j, k: (i, k)),
                pl.BlockSpec((tk, tn), lambda i, j, k: (k, j)),
                pl.BlockSpec((1, tn), lambda i, j, k: (0, j)),
            ],
            out_specs=pl.BlockSpec((tm, tn), lambda i, j, k: (i, j)),
            scratch_shapes=[pltpu.VMEM((tm, tn), jnp.float32)],
        ),
        compiler_params=pltpu.CompilerParams(
            dimension_semantics=("parallel", "parallel", "arbitrary")
        ),
    )(a_p, w_p, b_p)

    if (Mp, Np) != (M, N):
        out = out[:M, :N]
    return out


# -----------------------------------------------------------------------------
# Fused residual-add + layernorm (row-tiled)
# -----------------------------------------------------------------------------
def _add_layernorm_kernel(x_ref, r_ref, g_ref, b_ref, o_ref):
    x = x_ref[...] + r_ref[...]
    mu = jnp.mean(x, axis=-1, keepdims=True)
    var = jnp.mean(jnp.square(x - mu), axis=-1, keepdims=True)
    xn = (x - mu) * jax.lax.rsqrt(var + 1e-5)
    o_ref[...] = xn * g_ref[...] + b_ref[...]


def pallas_add_layernorm(x, r, gamma, beta):
    """LayerNorm(x + r); x, r: [M, D]; gamma/beta: [D]."""
    M, D = x.shape
    tm, Mp = _choose_tile(M, _SUBLANE, 256)

    x_p = x.astype(jnp.float32)
    r_p = r.astype(jnp.float32)
    if Mp != M:
        pad = ((0, Mp - M), (0, 0))
        x_p = jnp.pad(x_p, pad)
        r_p = jnp.pad(r_p, pad)

    out = pl.pallas_call(
        _add_layernorm_kernel,
        out_shape=jax.ShapeDtypeStruct((Mp, D), jnp.float32),
        grid=(Mp // tm,),
        in_specs=[
            pl.BlockSpec((tm, D), lambda i: (i, 0)),
            pl.BlockSpec((tm, D), lambda i: (i, 0)),
            pl.BlockSpec((1, D), lambda i: (0, 0)),
            pl.BlockSpec((1, D), lambda i: (0, 0)),
        ],
        out_specs=pl.BlockSpec((tm, D), lambda i: (i, 0)),
        compiler_params=pltpu.CompilerParams(dimension_semantics=("parallel",)),
    )(x_p, r_p, gamma.reshape(1, D).astype(jnp.float32),
      beta.reshape(1, D).astype(jnp.float32))

    if Mp != M:
        out = out[:M]
    return out


# -----------------------------------------------------------------------------
# Per-batch multi-head attention (all heads in one grid step)
# -----------------------------------------------------------------------------
def _attn_kernel(kpm_ref, q_ref, k_ref, v_ref, o_ref, *, scale):
    q = q_ref[0]          # [nH, L, d] bf16
    k = k_ref[0]          # [nH, L, d] bf16
    v = v_ref[0]          # [nH, L, d] bf16
    L = q.shape[1]

    # scores: contract last dims directly (no explicit transpose of K)
    s = jnp.einsum("hqd,hkd->hqk", q, k,
                   preferred_element_type=jnp.float32) * scale   # [nH, L, L]

    # additive causal mask built in-kernel + additive key-pad mask ([1, 1, L])
    row = jax.lax.broadcasted_iota(jnp.int32, (L, L), 0)
    col = jax.lax.broadcasted_iota(jnp.int32, (L, L), 1)
    causal = jnp.where(col <= row, 0.0, -1e10).astype(jnp.float32)
    s = s + causal[None, :, :] + kpm_ref[...]

    s = s - jnp.max(s, axis=-1, keepdims=True)
    p = jnp.exp(s)
    p = p * pl.reciprocal(jnp.sum(p, axis=-1, keepdims=True), approx=True)

    o_ref[0] = jnp.einsum("hqk,hkd->hqd", p.astype(v.dtype), v,
                          preferred_element_type=jnp.float32)


def pallas_attention(q, k, v, kpm_add, *, scale):
    """q/k/v: [B, nH, L, d] bf16; kpm_add: [B, 1, L] additive mask. -> [B, nH, L, d] f32."""
    B, nH, L, d = q.shape
    kern = functools.partial(_attn_kernel, scale=scale)
    return pl.pallas_call(
        kern,
        out_shape=jax.ShapeDtypeStruct((B, nH, L, d), jnp.float32),
        grid=(B,),
        in_specs=[
            pl.BlockSpec((1, 1, L), lambda b: (b, 0, 0)),
            pl.BlockSpec((1, nH, L, d), lambda b: (b, 0, 0, 0)),
            pl.BlockSpec((1, nH, L, d), lambda b: (b, 0, 0, 0)),
            pl.BlockSpec((1, nH, L, d), lambda b: (b, 0, 0, 0)),
        ],
        out_specs=pl.BlockSpec((1, nH, L, d), lambda b: (b, 0, 0, 0)),
        compiler_params=pltpu.CompilerParams(dimension_semantics=("parallel",)),
    )(kpm_add, q, k, v)


# -----------------------------------------------------------------------------
# Parameter init (deterministic, synthetic — no checkpoint loading)
# -----------------------------------------------------------------------------
def _dense(key, fan_in, fan_out):
    # weights stored in bf16 once (no per-call recast), biases in f32
    w = (jax.random.normal(key, (fan_in, fan_out), jnp.float32) * 0.02).astype(jnp.bfloat16)
    b = jnp.zeros((fan_out,), jnp.float32)
    return w, b


def build_params(key, *, num_tokens, hid_dim, n_layers, pf_dim, max_len,
                 img_flat_dim, clip_dim):
    keys = jax.random.split(key, 6 + n_layers)
    p = {}
    # TODO(synk): the real encoder wraps an external pretrained CLIP backbone;
    # here CLIP is replaced by a deterministic linear projection of the flattened image.
    p["clip_w"], p["clip_b"] = _dense(keys[0], img_flat_dim, clip_dim)
    p["enc_w"], p["enc_b"] = _dense(keys[1], clip_dim, hid_dim)   # ImageEncoderClip fc
    p["tok_emb"] = jax.random.normal(keys[2], (num_tokens, hid_dim), jnp.float32) * 0.02
    p["pos_emb"] = jax.random.normal(keys[3], (max_len, hid_dim), jnp.float32) * 0.02
    p["out_w"], p["out_b"] = _dense(keys[4], hid_dim, num_tokens)

    layers = []
    for li in range(n_layers):
        lk = jax.random.split(keys[6 + li], 4)
        lp = {}
        # fused Q|K|V projection: single [H, 3H] weight
        lp["wqkv"], lp["bqkv"] = _dense(lk[0], hid_dim, 3 * hid_dim)
        lp["wo"], lp["bo"] = _dense(lk[1], hid_dim, hid_dim)
        lp["w1"], lp["b1"] = _dense(lk[2], hid_dim, pf_dim)
        lp["w2"], lp["b2"] = _dense(lk[3], pf_dim, hid_dim)
        lp["ln1_g"] = jnp.ones((hid_dim,), jnp.float32)
        lp["ln1_b"] = jnp.zeros((hid_dim,), jnp.float32)
        lp["ln2_g"] = jnp.ones((hid_dim,), jnp.float32)
        lp["ln2_b"] = jnp.zeros((hid_dim,), jnp.float32)
        layers.append(lp)
    p["layers"] = layers
    return p


# -----------------------------------------------------------------------------
# Model forward (inference: dropout is identity)
# -----------------------------------------------------------------------------
def _decoder_layer(x, kpm_add, lp, n_heads):
    B, L, H = x.shape
    d = H // n_heads
    xf = x.reshape(B * L, H)

    # fused QKV projection -> [B*L, 3H], split into per-head q/k/v
    qkv = pallas_linear(xf, lp["wqkv"], lp["bqkv"])
    qkv = qkv.reshape(B, L, 3, n_heads, d).transpose(2, 0, 3, 1, 4)  # [3, B, nH, L, d]
    q = qkv[0].astype(jnp.bfloat16)
    k = qkv[1].astype(jnp.bfloat16)
    v = qkv[2].astype(jnp.bfloat16)

    attn = pallas_attention(q, k, v, kpm_add, scale=1.0 / math.sqrt(d))  # [B,nH,L,d]
    attn = attn.transpose(0, 2, 1, 3).reshape(B * L, H)
    attn = pallas_linear(attn, lp["wo"], lp["bo"])                       # [B*L, H]

    # post-LN residual blocks (residual add fused into the layernorm kernel)
    x1 = pallas_add_layernorm(xf, attn, lp["ln1_g"], lp["ln1_b"])        # [B*L, H]

    h = pallas_linear(x1, lp["w1"], lp["b1"], activation="relu")         # fused ReLU
    h = pallas_linear(h, lp["w2"], lp["b2"])

    x2 = pallas_add_layernorm(x1, h, lp["ln2_g"], lp["ln2_b"])
    return x2.reshape(B, L, H)


def forward(params, images, captions, *, n_heads, pad_index):
    """CaptioningTransformerBase.forward(images, captions)."""
    B = images.shape[0]
    H = params["tok_emb"].shape[1]
    V = params["tok_emb"].shape[0]

    # ---- ImageEncoderClip (spatial_features=False): one embedding per image ----
    img_flat = images.reshape(B, -1).astype(jnp.float32)
    clip_feat = pallas_linear(img_flat, params["clip_w"], params["clip_b"])
    image_emb = pallas_linear(clip_feat, params["enc_w"], params["enc_b"])  # [B, H]

    # ---- SelfAttentionTransformerDecoder with prepended start embedding ----
    tok = jnp.take(params["tok_emb"], captions, axis=0) * jnp.sqrt(jnp.float32(H))
    x = jnp.concatenate([image_emb[:, None, :], tok], axis=1)  # [B, L, H], L = T+1
    L = x.shape[1]
    x = x + params["pos_emb"][:L][None, :, :]

    # additive key-padding mask (image token never pad); causal part built in-kernel
    key_not_pad = jnp.concatenate(
        [jnp.ones((B, 1), dtype=bool), captions != pad_index], axis=1
    )                                                                 # [B, L]
    kpm_add = jnp.where(key_not_pad, 0.0, -1e10).astype(jnp.float32)[:, None, :]  # [B,1,L]

    for lp in params["layers"]:
        x = _decoder_layer(x, kpm_add, lp, n_heads)

    logits = pallas_linear(x.reshape(B * L, H), params["out_w"], params["out_b"])
    return logits.reshape(B, L, V)


# -----------------------------------------------------------------------------
# Demo
# -----------------------------------------------------------------------------
if __name__ == "__main__":
    # small, forward-consistent shapes
    B, C, IH, IW = 2, 4, 16, 16
    T = 8
    NUM_TOKENS = 50
    HID = 32
    N_LAYERS = 2
    N_HEADS = 4
    PF_DIM = 64
    MAX_LEN = 16
    PAD_INDEX = 0
    CLIP_DIM = 64

    key = jax.random.PRNGKey(0)
    k_param, k_img, k_cap = jax.random.split(key, 3)

    params = build_params(
        k_param,
        num_tokens=NUM_TOKENS,
        hid_dim=HID,
        n_layers=N_LAYERS,
        pf_dim=PF_DIM,
        max_len=MAX_LEN,
        img_flat_dim=C * IH * IW,
        clip_dim=CLIP_DIM,
    )

    images = jax.random.normal(k_img, (B, C, IH, IW), jnp.float32)
    captions = jax.random.randint(k_cap, (B, T), 1, NUM_TOKENS, dtype=jnp.int32)
    captions = captions.at[:, -2:].set(PAD_INDEX)  # exercise pad masking

    fwd = jax.jit(functools.partial(forward, n_heads=N_HEADS, pad_index=PAD_INDEX))
    out = fwd(params, images, captions)
    out = jax.block_until_ready(out)

    assert out.shape == (B, T + 1, NUM_TOKENS), out.shape
    assert out.dtype == jnp.float32
    assert bool(jnp.all(jnp.isfinite(out)))
    print("KERNEL_OK")
</pallas_src>

<mosaic_0001>
module attributes {stable_mosaic.version = 11 : i64} {
  func.func @_matmul_bias_kernel(%arg0: i32, %arg1: i32, %arg2: i32, %arg3: memref<8x512xbf16, #tpu.memory_space<vmem>>, %arg4: memref<512x128xbf16, #tpu.memory_space<vmem>>, %arg5: memref<1x128xf32, #tpu.memory_space<vmem>>, %arg6: memref<8x128xf32, #tpu.memory_space<vmem>>, %arg7: memref<8x128xf32, #tpu.memory_space<vmem>>) attributes {dimension_semantics = [#tpu.dimension_semantics<parallel>, #tpu.dimension_semantics<parallel>, #tpu.dimension_semantics<arbitrary>], iteration_bounds = array<i64: 1, 1, 2>, scalar_prefetch = 0 : i64, scratch_operands = 1 : i64, tpu.core_type = #tpu.core_type<tc>, window_params = [{transform_indices = @transform_0, window_bounds = array<i64: 8, 512>}, {transform_indices = @transform_1, window_bounds = array<i64: 512, 128>}, {transform_indices = @transform_2, window_bounds = array<i64: 1, 128>}, {transform_indices = @transform_3, window_bounds = array<i64: 8, 128>}]} {
    %c0_i32 = arith.constant 0 : i32
    %0 = arith.cmpi eq, %arg2, %c0_i32 : i32
    %1 = arith.extui %0 : i1 to i32
    %c0_i32_0 = arith.constant 0 : i32
    %2 = arith.cmpi ne, %1, %c0_i32_0 : i32
    scf.if %2 {
      %cst_9 = arith.constant 0.000000e+00 : f32
      %12 = vector.broadcast %cst_9 : f32 to vector<8x128xf32>
      %c0_10 = arith.constant 0 : index
      %c0_11 = arith.constant 0 : index
      %13 = vector.load %arg7[%c0_10, %c0_11] : memref<8x128xf32, #tpu.memory_space<vmem>>, vector<8x128xf32>
      tpu.vector_store %arg7[%c0_10, %c0_11], %12 {strides = array<i32>} : memref<8x128xf32, #tpu.memory_space<vmem>>, vector<8x128xf32>,
    } else {
    }
    %c0 = arith.constant 0 : index
    %c0_1 = arith.constant 0 : index
    %3 = vector.load %arg7[%c0, %c0_1] : memref<8x128xf32, #tpu.memory_space<vmem>>, vector<8x128xf32>
    %c0_2 = arith.constant 0 : index
    %c0_3 = arith.constant 0 : index
    %4 = vector.load %arg3[%c0_2, %c0_3] : memref<8x512xbf16, #tpu.memory_space<vmem>>, vector<8x512xbf16>
    %c0_4 = arith.constant 0 : index
    %c0_5 = arith.constant 0 : index
    %5 = vector.load %arg4[%c0_4, %c0_5] : memref<512x128xbf16, #tpu.memory_space<vmem>>, vector<512x128xbf16>
    %cst = arith.constant dense<0.000000e+00> : vector<8x128xf32>
    %6 = tpu.matmul %4, %5, %cst {dimension_numbers = #tpu.dot_dimension_numbers<[1], [0], [0], [1], [0, 0, 1, 1], [], []>} : vector<8x512xbf16>, vector<512x128xbf16>, vector<8x128xf32> -> vector<8x128xf32>
    %7 = arith.addf %3, %6 : vector<8x128xf32>
    %c0_6 = arith.constant 0 : index
    %c0_7 = arith.constant 0 : index
    %8 = vector.load %arg7[%c0_6, %c0_7] : memref<8x128xf32, #tpu.memory_space<vmem>>, vector<8x128xf32>
    tpu.vector_store %arg7[%c0_6, %c0_7], %7 {strides = array<i32>} : memref<8x128xf32, #tpu.memory_space<vmem>>, vector<8x128xf32>,
    %c1_i32 = arith.constant 1 : i32
    %9 = arith.cmpi eq, %arg2, %c1_i32 : i32
    %10 = arith.extui %9 : i1 to i32
    %c0_i32_8 = arith.constant 0 : i32
    %11 = arith.cmpi ne, %10, %c0_i32_8 : i32
    scf.if %11 {
      %c0_9 = arith.constant 0 : index
      %c0_10 = arith.constant 0 : index
      %12 = vector.load %arg7[%c0_9, %c0_10] : memref<8x128xf32, #tpu.memory_space<vmem>>, vector<8x128xf32>
      %c0_11 = arith.constant 0 : index
      %c0_12 = arith.constant 0 : index
      %13 = vector.load %arg5[%c0_11, %c0_12] : memref<1x128xf32, #tpu.memory_space<vmem>>, vector<1x128xf32>
      %14 = vector.broadcast %13 : vector<1x128xf32> to vector<8x128xf32>
      %15 = arith.addf %12, %14 : vector<8x128xf32>
      %c0_13 = arith.constant 0 : index
      %c0_14 = arith.constant 0 : index
      %16 = vector.load %arg6[%c0_13, %c0_14] : memref<8x128xf32, #tpu.memory_space<vmem>>, vector<8x128xf32>
      tpu.vector_store %arg6[%c0_13, %c0_14], %15 {strides = array<i32>} : memref<8x128xf32, #tpu.memory_space<vmem>>, vector<8x128xf32>,
    } else {
    }
    return
  }
  func.func @transform_0(%arg0: i32, %arg1: i32, %arg2: i32) -> (i32, i32) {
    %c0_i32 = arith.constant 0 : i32
    return %arg0, %arg2 : i32, i32
  }
  func.func @transform_1(%arg0: i32, %arg1: i32, %arg2: i32) -> (i32, i32) {
    %c0_i32 = arith.constant 0 : i32
    return %arg2, %arg1 : i32, i32
  }
  func.func @transform_2(%arg0: i32, %arg1: i32, %arg2: i32) -> (i32, i32) {
    %c0_i32 = arith.constant 0 : i32
    %c0_i32_0 = arith.constant 0 : i32
    return %c0_i32, %arg1 : i32, i32
  }
  func.func @transform_3(%arg0: i32, %arg1: i32, %arg2: i32) -> (i32, i32) {
    %c0_i32 = arith.constant 0 : i32
    return %arg0, %arg1 : i32, i32
  }
}

module attributes {stable_mosaic.version = 11 : i64} {
  func.func @_matmul_bias_kernel(%arg0: i32, %arg1: i32, %arg2: i32, %arg3: memref<8x128xbf16, #tpu.memory_space<vmem>>, %arg4: memref<128x128xbf16, #tpu.memory_space<vmem>>, %arg5: memref<1x128xf32, #tpu.memory_space<vmem>>, %arg6: memref<8x128xf32, #tpu.memory_space<vmem>>, %arg7: memref<8x128xf32, #tpu.memory_space<vmem>>) attributes {dimension_semantics = [#tpu.dimension_semantics<parallel>, #tpu.dimension_semantics<parallel>, #tpu.dimension_semantics<arbitrary>], iteration_bounds = array<i64: 1, 1, 1>, scalar_prefetch = 0 : i64, scratch_operands = 1 : i64, tpu.core_type = #tpu.core_type<tc>, window_params = [{transform_indices = @transform_0, window_bounds = array<i64: 8, 128>}, {transform_indices = @transform_1, window_bounds = array<i64: 128, 128>}, {transform_indices = @transform_2, window_bounds = array<i64: 1, 128>}, {transform_indices = @transform_3, window_bounds = array<i64: 8, 128>}]} {
    %c0_i32 = arith.constant 0 : i32
    %0 = arith.cmpi eq, %arg2, %c0_i32 : i32
    %1 = arith.extui %0 : i1 to i32
    %c0_i32_0 = arith.constant 0 : i32
    %2 = arith.cmpi ne, %1, %c0_i32_0 : i32
    scf.if %2 {
      %cst_10 = arith.constant 0.000000e+00 : f32
      %12 = vector.broadcast %cst_10 : f32 to vector<8x128xf32>
      %c0_11 = arith.constant 0 : index
      %c0_12 = arith.constant 0 : index
      %13 = vector.load %arg7[%c0_11, %c0_12] : memref<8x128xf32, #tpu.memory_space<vmem>>, vector<8x128xf32>
      tpu.vector_store %arg7[%c0_11, %c0_12], %12 {strides = array<i32>} : memref<8x128xf32, #tpu.memory_space<vmem>>, vector<8x128xf32>,
    } else {
    }
    %c0 = arith.constant 0 : index
    %c0_1 = arith.constant 0 : index
    %3 = vector.load %arg7[%c0, %c0_1] : memref<8x128xf32, #tpu.memory_space<vmem>>, vector<8x128xf32>
    %c0_2 = arith.constant 0 : index
    %c0_3 = arith.constant 0 : index
    %4 = vector.load %arg3[%c0_2, %c0_3] : memref<8x128xbf16, #tpu.memory_space<vmem>>, vector<8x128xbf16>
    %c0_4 = arith.constant 0 : index
    %c0_5 = arith.constant 0 : index
    %5 = vector.load %arg4[%c0_4, %c0_5] : memref<128x128xbf16, #tpu.memory_space<vmem>>, vector<128x128xbf16>
    %cst = arith.constant dense<0.000000e+00> : vector<8x128xf32>
    %6 = tpu.matmul %4, %5, %cst {dimension_numbers = #tpu.dot_dimension_numbers<[1], [0], [0], [1], [0, 0, 1, 1], [], []>} : vector<8x128xbf16>, vector<128x128xbf16>, vector<8x128xf32> -> vector<8x128xf32>
    %7 = arith.addf %3, %6 : vector<8x128xf32>
    %c0_6 = arith.constant 0 : index
    %c0_7 = arith.constant 0 : index
    %8 = vector.load %arg7[%c0_6, %c0_7] : memref<8x128xf32, #tpu.memory_space<vmem>>, vector<8x128xf32>
    tpu.vector_store %arg7[%c0_6, %c0_7], %7 {strides = array<i32>} : memref<8x128xf32, #tpu.memory_space<vmem>>, vector<8x128xf32>,
    %c0_i32_8 = arith.constant 0 : i32
    %9 = arith.cmpi eq, %arg2, %c0_i32_8 : i32
    %10 = arith.extui %9 : i1 to i32
    %c0_i32_9 = arith.constant 0 : i32
    %11 = arith.cmpi ne, %10, %c0_i32_9 : i32
    scf.if %11 {
      %c0_10 = arith.constant 0 : index
      %c0_11 = arith.constant 0 : index
      %12 = vector.load %arg7[%c0_10, %c0_11] : memref<8x128xf32, #tpu.memory_space<vmem>>, vector<8x128xf32>
      %c0_12 = arith.constant 0 : index
      %c0_13 = arith.constant 0 : index
      %13 = vector.load %arg5[%c0_12, %c0_13] : memref<1x128xf32, #tpu.memory_space<vmem>>, vector<1x128xf32>
      %14 = vector.broadcast %13 : vector<1x128xf32> to vector<8x128xf32>
      %15 = arith.addf %12, %14 : vector<8x128xf32>
      %c0_14 = arith.constant 0 : index
      %c0_15 = arith.constant 0 : index
      %16 = vector.load %arg6[%c0_14, %c0_15] : memref<8x128xf32, #tpu.memory_space<vmem>>, vector<8x128xf32>
      tpu.vector_store %arg6[%c0_14, %c0_15], %15 {strides = array<i32>} : memref<8x128xf32, #tpu.memory_space<vmem>>, vector<8x128xf32>,
    } else {
    }
    return
  }
  func.func @transform_0(%arg0: i32, %arg1: i32, %arg2: i32) -> (i32, i32) {
    %c0_i32 = arith.constant 0 : i32
    return %arg0, %arg2 : i32, i32
  }
  func.func @transform_1(%arg0: i32, %arg1: i32, %arg2: i32) -> (i32, i32) {
    %c0_i32 = arith.constant 0 : i32
    return %arg2, %arg1 : i32, i32
  }
  func.func @transform_2(%arg0: i32, %arg1: i32, %arg2: i32) -> (i32, i32) {
    %c0_i32 = arith.constant 0 : i32
    %c0_i32_0 = arith.constant 0 : i32
    return %c0_i32, %arg1 : i32, i32
  }
  func.func @transform_3(%arg0: i32, %arg1: i32, %arg2: i32) -> (i32, i32) {
    %c0_i32 = arith.constant 0 : i32
    return %arg0, %arg1 : i32, i32
  }
}

module attributes {stable_mosaic.version = 11 : i64} {
  func.func @_matmul_bias_kernel(%arg0: i32, %arg1: i32, %arg2: i32, %arg3: memref<24x128xbf16, #tpu.memory_space<vmem>>, %arg4: memref<128x128xbf16, #tpu.memory_space<vmem>>, %arg5: memref<1x128xf32, #tpu.memory_space<vmem>>, %arg6: memref<24x128xf32, #tpu.memory_space<vmem>>, %arg7: memref<24x128xf32, #tpu.memory_space<vmem>>) attributes {dimension_semantics = [#tpu.dimension_semantics<parallel>, #tpu.dimension_semantics<parallel>, #tpu.dimension_semantics<arbitrary>], iteration_bounds = array<i64: 1, 1, 1>, scalar_prefetch = 0 : i64, scratch_operands = 1 : i64, tpu.core_type = #tpu.core_type<tc>, window_params = [{transform_indices = @transform_0, window_bounds = array<i64: 24, 128>}, {transform_indices = @transform_1, window_bounds = array<i64: 128, 128>}, {transform_indices = @transform_2, window_bounds = array<i64: 1, 128>}, {transform_indices = @transform_3, window_bounds = array<i64: 24, 128>}]} {
    %c0_i32 = arith.constant 0 : i32
    %0 = arith.cmpi eq, %arg2, %c0_i32 : i32
    %1 = arith.extui %0 : i1 to i32
    %c0_i32_0 = arith.constant 0 : i32
    %2 = arith.cmpi ne, %1, %c0_i32_0 : i32
    scf.if %2 {
      %cst_10 = arith.constant 0.000000e+00 : f32
      %12 = vector.broadcast %cst_10 : f32 to vector<24x128xf32>
      %c0_11 = arith.constant 0 : index
      %c0_12 = arith.constant 0 : index
      %13 = vector.load %arg7[%c0_11, %c0_12] : memref<24x128xf32, #tpu.memory_space<vmem>>, vector<24x128xf32>
      tpu.vector_store %arg7[%c0_11, %c0_12], %12 {strides = array<i32>} : memref<24x128xf32, #tpu.memory_space<vmem>>, vector<24x128xf32>,
    } else {
    }
    %c0 = arith.constant 0 : index
    %c0_1 = arith.constant 0 : index
    %3 = vector.load %arg7[%c0, %c0_1] : memref<24x128xf32, #tpu.memory_space<vmem>>, vector<24x128xf32>
    %c0_2 = arith.constant 0 : index
    %c0_3 = arith.constant 0 : index
    %4 = vector.load %arg3[%c0_2, %c0_3] : memref<24x128xbf16, #tpu.memory_space<vmem>>, vector<24x128xbf16>
    %c0_4 = arith.constant 0 : index
    %c0_5 = arith.constant 0 : index
    %5 = vector.load %arg4[%c0_4, %c0_5] : memref<128x128xbf16, #tpu.memory_space<vmem>>, vector<128x128xbf16>
    %cst = arith.constant dense<0.000000e+00> : vector<24x128xf32>
    %6 = tpu.matmul %4, %5, %cst {dimension_numbers = #tpu.dot_dimension_numbers<[1], [0], [0], [1], [0, 0, 1, 1], [], []>} : vector<24x128xbf16>, vector<128x128xbf16>, vector<24x128xf32> -> vector<24x128xf32>
    %7 = arith.addf %3, %6 : vector<24x128xf32>
    %c0_6 = arith.constant 0 : index
    %c0_7 = arith.constant 0 : index
    %8 = vector.load %arg7[%c0_6, %c0_7] : memref<24x128xf32, #tpu.memory_space<vmem>>, vector<24x128xf32>
    tpu.vector_store %arg7[%c0_6, %c0_7], %7 {strides = array<i32>} : memref<24x128xf32, #tpu.memory_space<vmem>>, vector<24x128xf32>,
    %c0_i32_8 = arith.constant 0 : i32
    %9 = arith.cmpi eq, %arg2, %c0_i32_8 : i32
    %10 = arith.extui %9 : i1 to i32
    %c0_i32_9 = arith.constant 0 : i32
    %11 = arith.cmpi ne, %10, %c0_i32_9 : i32
    scf.if %11 {
      %c0_10 = arith.constant 0 : index
      %c0_11 = arith.constant 0 : index
      %12 = vector.load %arg7[%c0_10, %c0_11] : memref<24x128xf32, #tpu.memory_space<vmem>>, vector<24x128xf32>
      %c0_12 = arith.constant 0 : index
      %c0_13 = arith.constant 0 : index
      %13 = vector.load %arg5[%c0_12, %c0_13] : memref<1x128xf32, #tpu.memory_space<vmem>>, vector<1x128xf32>
      %14 = vector.broadcast %13 : vector<1x128xf32> to vector<24x128xf32>
      %15 = arith.addf %12, %14 : vector<24x128xf32>
      %c0_14 = arith.constant 0 : index
      %c0_15 = arith.constant 0 : index
      %16 = vector.load %arg6[%c0_14, %c0_15] : memref<24x128xf32, #tpu.memory_space<vmem>>, vector<24x128xf32>
      tpu.vector_store %arg6[%c0_14, %c0_15], %15 {strides = array<i32>} : memref<24x128xf32, #tpu.memory_space<vmem>>, vector<24x128xf32>,
    } else {
    }
    return
  }
  func.func @transform_0(%arg0: i32, %arg1: i32, %arg2: i32) -> (i32, i32) {
    %c0_i32 = arith.constant 0 : i32
    return %arg0, %arg2 : i32, i32
  }
  func.func @transform_1(%arg0: i32, %arg1: i32, %arg2: i32) -> (i32, i32) {
    %c0_i32 = arith.constant 0 : i32
    return %arg2, %arg1 : i32, i32
  }
  func.func @transform_2(%arg0: i32, %arg1: i32, %arg2: i32) -> (i32, i32) {
    %c0_i32 = arith.constant 0 : i32
    %c0_i32_0 = arith.constant 0 : i32
    return %c0_i32, %arg1 : i32, i32
  }
  func.func @transform_3(%arg0: i32, %arg1: i32, %arg2: i32) -> (i32, i32) {
    %c0_i32 = arith.constant 0 : i32
    return %arg0, %arg1 : i32, i32
  }
}

module attributes {stable_mosaic.version = 11 : i64} {
  func.func @_attn_kernel(%arg0: i32, %arg1: memref<1x1x9xf32, #tpu.memory_space<vmem>>, %arg2: memref<1x4x9x8xbf16, #tpu.memory_space<vmem>>, %arg3: memref<1x4x9x8xbf16, #tpu.memory_space<vmem>>, %arg4: memref<1x4x9x8xbf16, #tpu.memory_space<vmem>>, %arg5: memref<1x4x9x8xf32, #tpu.memory_space<vmem>>) attributes {dimension_semantics = [#tpu.dimension_semantics<parallel>], iteration_bounds = array<i64: 2>, scalar_prefetch = 0 : i64, scratch_operands = 0 : i64, tpu.core_type = #tpu.core_type<tc>, window_params = [{transform_indices = @transform_0, window_bounds = array<i64: 1, 1, 9>}, {transform_indices = @transform_1, window_bounds = array<i64: 1, 4, 9, 8>}, {transform_indices = @transform_2, window_bounds = array<i64: 1, 4, 9, 8>}, {transform_indices = @transform_3, window_bounds = array<i64: 1, 4, 9, 8>}, {transform_indices = @transform_4, window_bounds = array<i64: 1, 4, 9, 8>}]} {
    %c0 = arith.constant 0 : index
    %c0_0 = arith.constant 0 : index
    %c0_1 = arith.constant 0 : index
    %c0_2 = arith.constant 0 : index
    %0 = vector.load %arg2[%c0, %c0_0, %c0_1, %c0_2] : memref<1x4x9x8xbf16, #tpu.memory_space<vmem>>, vector<1x4x9x8xbf16>
    %1 = vector.shape_cast %0 : vector<1x4x9x8xbf16> to vector<4x9x8xbf16>
    %c0_3 = arith.constant 0 : index
    %c0_4 = arith.constant 0 : index
    %c0_5 = arith.constant 0 : index
    %c0_6 = arith.constant 0 : index
    %2 = vector.load %arg3[%c0_3, %c0_4, %c0_5, %c0_6] : memref<1x4x9x8xbf16, #tpu.memory_space<vmem>>, vector<1x4x9x8xbf16>
    %3 = vector.shape_cast %2 : vector<1x4x9x8xbf16> to vector<4x9x8xbf16>
    %c0_7 = arith.constant 0 : index
    %c0_8 = arith.constant 0 : index
    %c0_9 = arith.constant 0 : index
    %c0_10 = arith.constant 0 : index
    %4 = vector.load %arg4[%c0_7, %c0_8, %c0_9, %c0_10] : memref<1x4x9x8xbf16, #tpu.memory_space<vmem>>, vector<1x4x9x8xbf16>
    %5 = vector.shape_cast %4 : vector<1x4x9x8xbf16> to vector<4x9x8xbf16>
    "tpu.trace_start"() <{level = 10 : i32, message = "hqd,hkd->hqk"}> : () -> ()
    %cst = arith.constant dense<0.000000e+00> : vector<4x9x9xf32>
    %6 = tpu.matmul %1, %3, %cst {dimension_numbers = #tpu.dot_dimension_numbers<[2], [2], [1], [1], [0, 0, 0, 1, 1, 1], [0], [0]>} : vector<4x9x8xbf16>, vector<4x9x8xbf16>, vector<4x9x9xf32> -> vector<4x9x9xf32>
    "tpu.trace_stop"() : () -> ()
    %cst_11 = arith.constant 0.353553385 : f32
    %7 = vector.broadcast %cst_11 : f32 to vector<4x9x9xf32>
    %8 = arith.mulf %6, %7 : vector<4x9x9xf32>
    %9 = tpu.iota {dimensions = array<i32: 0>} : vector<9x9xi32>
    %10 = tpu.iota {dimensions = array<i32: 1>} : vector<9x9xi32>
    %11 = arith.cmpi sle, %10, %9 : vector<9x9xi32>
    %cst_12 = arith.constant 0.000000e+00 : f32
    %cst_13 = arith.constant -1.000000e+10 : f32
    %12 = vector.broadcast %cst_12 : f32 to vector<9x9xf32>
    %13 = vector.broadcast %cst_13 : f32 to vector<9x9xf32>
    %14 = arith.select %11, %12, %13 : vector<9x9xi1>, vector<9x9xf32>
    %15 = vector.shape_cast %14 : vector<9x9xf32> to vector<1x9x9xf32>
    %16 = vector.broadcast %15 : vector<1x9x9xf32> to vector<4x9x9xf32>
    %17 = arith.addf %8, %16 : vector<4x9x9xf32>
    %c0_14 = arith.constant 0 : index
    %c0_15 = arith.constant 0 : index
    %c0_16 = arith.constant 0 : index
    %18 = vector.load %arg1[%c0_14, %c0_15, %c0_16] : memref<1x1x9xf32, #tpu.memory_space<vmem>>, vector<1x1x9xf32>
    %19 = vector.broadcast %18 : vector<1x1x9xf32> to vector<4x9x9xf32>
    %20 = arith.addf %17, %19 : vector<4x9x9xf32>
    %cst_17 = arith.constant dense<0xFF800000> : vector<4x9xf32>
    %21 = vector.multi_reduction <maximumf>, %20, %cst_17 [2] : vector<4x9x9xf32> to vector<4x9xf32>
    %22 = vector.shape_cast %21 : vector<4x9xf32> to vector<4x9x1xf32>
    %23 = vector.broadcast %22 : vector<4x9x1xf32> to vector<4x9x9xf32>
    %24 = arith.subf %20, %23 : vector<4x9x9xf32>
    %25 = math.exp %24 : vector<4x9x9xf32>
    %cst_18 = arith.constant dense<0.000000e+00> : vector<4x9xf32>
    %26 = vector.multi_reduction <add>, %25, %cst_18 [2] : vector<4x9x9xf32> to vector<4x9xf32>
    %27 = vector.shape_cast %26 : vector<4x9xf32> to vector<4x9x1xf32>
    %28 = tpu.reciprocal %27 {approx = true} : vector<4x9x1xf32> -> vector<4x9x1xf32>
    %29 = vector.broadcast %28 : vector<4x9x1xf32> to vector<4x9x9xf32>
    %30 = arith.mulf %25, %29 : vector<4x9x9xf32>
    %31 = arith.truncf %30 : vector<4x9x9xf32> to vector<4x9x9xbf16>
    "tpu.trace_start"() <{level = 10 : i32, message = "hqk,hkd->hqd"}> : () -> ()
    %cst_19 = arith.constant dense<0.000000e+00> : vector<4x9x8xf32>
    %32 = tpu.matmul %31, %5, %cst_19 {dimension_numbers = #tpu.dot_dimension_numbers<[2], [1], [1], [2], [0, 0, 0, 1, 1, 2], [0], [0]>} : vector<4x9x9xbf16>, vector<4x9x8xbf16>, vector<4x9x8xf32> -> vector<4x9x8xf32>
    "tpu.trace_stop"() : () -> ()
    %c0_20 = arith.constant 0 : index
    %c0_21 = arith.constant 0 : index
    %c0_22 = arith.constant 0 : index
    %c0_23 = arith.constant 0 : index
    %33 = vector.load %arg5[%c0_20, %c0_21, %c0_22, %c0_23] : memref<1x4x9x8xf32, #tpu.memory_space<vmem>>, vector<1x4x9x8xf32>
    %34 = vector.shape_cast %33 : vector<1x4x9x8xf32> to vector<4x9x8xf32>
    %35 = vector.shape_cast %32 : vector<4x9x8xf32> to vector<1x4x9x8xf32>
    tpu.vector_store %arg5[%c0_20, %c0_21, %c0_22, %c0_23], %35 {strides = array<i32>} : memref<1x4x9x8xf32, #tpu.memory_space<vmem>>, vector<1x4x9x8xf32>,
    return
  }
  func.func @transform_0(%arg0: i32) -> (i32, i32, i32) {
    %c0_i32 = arith.constant 0 : i32
    %c0_i32_0 = arith.constant 0 : i32
    %c0_i32_1 = arith.constant 0 : i32
    return %arg0, %c0_i32, %c0_i32_0 : i32, i32, i32
  }
  func.func @transform_1(%arg0: i32) -> (i32, i32, i32, i32) {
    %c0_i32 = arith.constant 0 : i32
    %c0_i32_0 = arith.constant 0 : i32
    %c0_i32_1 = arith.constant 0 : i32
    %c0_i32_2 = arith.constant 0 : i32
    return %arg0, %c0_i32, %c0_i32_0, %c0_i32_1 : i32, i32, i32, i32
  }
  func.func @transform_2(%arg0: i32) -> (i32, i32, i32, i32) {
    %c0_i32 = arith.constant 0 : i32
    %c0_i32_0 = arith.constant 0 : i32
    %c0_i32_1 = arith.constant 0 : i32
    %c0_i32_2 = arith.constant 0 : i32
    return %arg0, %c0_i32, %c0_i32_0, %c0_i32_1 : i32, i32, i32, i32
  }
  func.func @transform_3(%arg0: i32) -> (i32, i32, i32, i32) {
    %c0_i32 = arith.constant 0 : i32
    %c0_i32_0 = arith.constant 0 : i32
    %c0_i32_1 = arith.constant 0 : i32
    %c0_i32_2 = arith.constant 0 : i32
    return %arg0, %c0_i32, %c0_i32_0, %c0_i32_1 : i32, i32, i32, i32
  }
  func.func @transform_4(%arg0: i32) -> (i32, i32, i32, i32) {
    %c0_i32 = arith.constant 0 : i32
    %c0_i32_0 = arith.constant 0 : i32
    %c0_i32_1 = arith.constant 0 : i32
    %c0_i32_2 = arith.constant 0 : i32
    return %arg0, %c0_i32, %c0_i32_0, %c0_i32_1 : i32, i32, i32, i32
  }
}

module attributes {stable_mosaic.version = 11 : i64} {
  func.func @_add_layernorm_kernel(%arg0: i32, %arg1: memref<24x32xf32, #tpu.memory_space<vmem>>, %arg2: memref<24x32xf32, #tpu.memory_space<vmem>>, %arg3: memref<1x32xf32, #tpu.memory_space<vmem>>, %arg4: memref<1x32xf32, #tpu.memory_space<vmem>>, %arg5: memref<24x32xf32, #tpu.memory_space<vmem>>) attributes {dimension_semantics = [#tpu.dimension_semantics<parallel>], iteration_bounds = array<i64: 1>, scalar_prefetch = 0 : i64, scratch_operands = 0 : i64, tpu.core_type = #tpu.core_type<tc>, window_params = [{transform_indices = @transform_0, window_bounds = array<i64: 24, 32>}, {transform_indices = @transform_1, window_bounds = array<i64: 24, 32>}, {pipeline_mode = #tpu.pipeline_mode<synchronous>, transform_indices = @transform_2, window_bounds = array<i64: 1, 32>}, {pipeline_mode = #tpu.pipeline_mode<synchronous>, transform_indices = @transform_3, window_bounds = array<i64: 1, 32>}, {transform_indices = @transform_4, window_bounds = array<i64: 24, 32>}]} {
    %c0 = arith.constant 0 : index
    %c0_0 = arith.constant 0 : index
    %0 = vector.load %arg1[%c0, %c0_0] : memref<24x32xf32, #tpu.memory_space<vmem>>, vector<24x32xf32>
    %c0_1 = arith.constant 0 : index
    %c0_2 = arith.constant 0 : index
    %1 = vector.load %arg2[%c0_1, %c0_2] : memref<24x32xf32, #tpu.memory_space<vmem>>, vector<24x32xf32>
    %2 = arith.addf %0, %1 : vector<24x32xf32>
    %cst = arith.constant dense<0.000000e+00> : vector<24xf32>
    %3 = vector.multi_reduction <add>, %2, %cst [1] : vector<24x32xf32> to vector<24xf32>
    %4 = vector.shape_cast %3 : vector<24xf32> to vector<24x1xf32>
    %cst_3 = arith.constant 3.200000e+01 : f32
    %5 = vector.broadcast %cst_3 : f32 to vector<24x1xf32>
    %6 = arith.divf %4, %5 : vector<24x1xf32>
    %7 = vector.broadcast %6 : vector<24x1xf32> to vector<24x32xf32>
    %8 = arith.subf %2, %7 : vector<24x32xf32>
    %9 = arith.mulf %8, %8 : vector<24x32xf32>
    %cst_4 = arith.constant dense<0.000000e+00> : vector<24xf32>
    %10 = vector.multi_reduction <add>, %9, %cst_4 [1] : vector<24x32xf32> to vector<24xf32>
    %11 = vector.shape_cast %10 : vector<24xf32> to vector<24x1xf32>
    %cst_5 = arith.constant 3.200000e+01 : f32
    %12 = vector.broadcast %cst_5 : f32 to vector<24x1xf32>
    %13 = arith.divf %11, %12 : vector<24x1xf32>
    %14 = vector.broadcast %6 : vector<24x1xf32> to vector<24x32xf32>
    %15 = arith.subf %2, %14 : vector<24x32xf32>
    %cst_6 = arith.constant 9.99999974E-6 : f32
    %16 = vector.broadcast %cst_6 : f32 to vector<24x1xf32>
    %17 = arith.addf %13, %16 : vector<24x1xf32>
    %18 = math.rsqrt %17 : vector<24x1xf32>
    %19 = vector.broadcast %18 : vector<24x1xf32> to vector<24x32xf32>
    %20 = arith.mulf %15, %19 : vector<24x32xf32>
    %c0_7 = arith.constant 0 : index
    %c0_8 = arith.constant 0 : index
    %21 = vector.load %arg3[%c0_7, %c0_8] : memref<1x32xf32, #tpu.memory_space<vmem>>, vector<1x32xf32>
    %22 = vector.broadcast %21 : vector<1x32xf32> to vector<24x32xf32>
    %23 = arith.mulf %20, %22 : vector<24x32xf32>
    %c0_9 = arith.constant 0 : index
    %c0_10 = arith.constant 0 : index
    %24 = vector.load %arg4[%c0_9, %c0_10] : memref<1x32xf32, #tpu.memory_space<vmem>>, vector<1x32xf32>
    %25 = vector.broadcast %24 : vector<1x32xf32> to vector<24x32xf32>
    %26 = arith.addf %23, %25 : vector<24x32xf32>
    %c0_11 = arith.constant 0 : index
    %c0_12 = arith.constant 0 : index
    %27 = vector.load %arg5[%c0_11, %c0_12] : memref<24x32xf32, #tpu.memory_space<vmem>>, vector<24x32xf32>
    tpu.vector_store %arg5[%c0_11, %c0_12], %26 {strides = array<i32>} : memref<24x32xf32, #tpu.memory_space<vmem>>, vector<24x32xf32>,
    return
  }
  func.func @transform_0(%arg0: i32) -> (i32, i32) {
    %c0_i32 = arith.constant 0 : i32
    %c0_i32_0 = arith.constant 0 : i32
    return %arg0, %c0_i32 : i32, i32
  }
  func.func @transform_1(%arg0: i32) -> (i32, i32) {
    %c0_i32 = arith.constant 0 : i32
    %c0_i32_0 = arith.constant 0 : i32
    return %arg0, %c0_i32 : i32, i32
  }
  func.func @transform_2(%arg0: i32) -> (i32, i32) {
    %c0_i32 = arith.constant 0 : i32
    %c0_i32_0 = arith.constant 0 : i32
    %c0_i32_1 = arith.constant 0 : i32
    return %c0_i32, %c0_i32_0 : i32, i32
  }
  func.func @transform_3(%arg0: i32) -> (i32, i32) {
    %c0_i32 = arith.constant 0 : i32
    %c0_i32_0 = arith.constant 0 : i32
    %c0_i32_1 = arith.constant 0 : i32
    return %c0_i32, %c0_i32_0 : i32, i32
  }
  func.func @transform_4(%arg0: i32) -> (i32, i32) {
    %c0_i32 = arith.constant 0 : i32
    %c0_i32_0 = arith.constant 0 : i32
    return %arg0, %c0_i32 : i32, i32
  }
}

module attributes {stable_mosaic.version = 11 : i64} {
  func.func @_matmul_bias_kernel(%arg0: i32, %arg1: i32, %arg2: i32, %arg3: memref<24x128xbf16, #tpu.memory_space<vmem>>, %arg4: memref<128x128xbf16, #tpu.memory_space<vmem>>, %arg5: memref<1x128xf32, #tpu.memory_space<vmem>>, %arg6: memref<24x128xf32, #tpu.memory_space<vmem>>, %arg7: memref<24x128xf32, #tpu.memory_space<vmem>>) attributes {dimension_semantics = [#tpu.dimension_semantics<parallel>, #tpu.dimension_semantics<parallel>, #tpu.dimension_semantics<arbitrary>], iteration_bounds = array<i64: 1, 1, 1>, scalar_prefetch = 0 : i64, scratch_operands = 1 : i64, tpu.core_type = #tpu.core_type<tc>, window_params = [{transform_indices = @transform_0, window_bounds = array<i64: 24, 128>}, {transform_indices = @transform_1, window_bounds = array<i64: 128, 128>}, {transform_indices = @transform_2, window_bounds = array<i64: 1, 128>}, {transform_indices = @transform_3, window_bounds = array<i64: 24, 128>}]} {
    %c0_i32 = arith.constant 0 : i32
    %0 = arith.cmpi eq, %arg2, %c0_i32 : i32
    %1 = arith.extui %0 : i1 to i32
    %c0_i32_0 = arith.constant 0 : i32
    %2 = arith.cmpi ne, %1, %c0_i32_0 : i32
    scf.if %2 {
      %cst_10 = arith.constant 0.000000e+00 : f32
      %12 = vector.broadcast %cst_10 : f32 to vector<24x128xf32>
      %c0_11 = arith.constant 0 : index
      %c0_12 = arith.constant 0 : index
      %13 = vector.load %arg7[%c0_11, %c0_12] : memref<24x128xf32, #tpu.memory_space<vmem>>, vector<24x128xf32>
      tpu.vector_store %arg7[%c0_11, %c0_12], %12 {strides = array<i32>} : memref<24x128xf32, #tpu.memory_space<vmem>>, vector<24x128xf32>,
    } else {
    }
    %c0 = arith.constant 0 : index
    %c0_1 = arith.constant 0 : index
    %3 = vector.load %arg7[%c0, %c0_1] : memref<24x128xf32, #tpu.memory_space<vmem>>, vector<24x128xf32>
    %c0_2 = arith.constant 0 : index
    %c0_3 = arith.constant 0 : index
    %4 = vector.load %arg3[%c0_2, %c0_3] : memref<24x128xbf16, #tpu.memory_space<vmem>>, vector<24x128xbf16>
    %c0_4 = arith.constant 0 : index
    %c0_5 = arith.constant 0 : index
    %5 = vector.load %arg4[%c0_4, %c0_5] : memref<128x128xbf16, #tpu.memory_space<vmem>>, vector<128x128xbf16>
    %cst = arith.constant dense<0.000000e+00> : vector<24x128xf32>
    %6 = tpu.matmul %4, %5, %cst {dimension_numbers = #tpu.dot_dimension_numbers<[1], [0], [0], [1], [0, 0, 1, 1], [], []>} : vector<24x128xbf16>, vector<128x128xbf16>, vector<24x128xf32> -> vector<24x128xf32>
    %7 = arith.addf %3, %6 : vector<24x128xf32>
    %c0_6 = arith.constant 0 : index
    %c0_7 = arith.constant 0 : index
    %8 = vector.load %arg7[%c0_6, %c0_7] : memref<24x128xf32, #tpu.memory_space<vmem>>, vector<24x128xf32>
    tpu.vector_store %arg7[%c0_6, %c0_7], %7 {strides = array<i32>} : memref<24x128xf32, #tpu.memory_space<vmem>>, vector<24x128xf32>,
    %c0_i32_8 = arith.constant 0 : i32
    %9 = arith.cmpi eq, %arg2, %c0_i32_8 : i32
    %10 = arith.extui %9 : i1 to i32
    %c0_i32_9 = arith.constant 0 : i32
    %11 = arith.cmpi ne, %10, %c0_i32_9 : i32
    scf.if %11 {
      %c0_10 = arith.constant 0 : index
      %c0_11 = arith.constant 0 : index
      %12 = vector.load %arg7[%c0_10, %c0_11] : memref<24x128xf32, #tpu.memory_space<vmem>>, vector<24x128xf32>
      %c0_12 = arith.constant 0 : index
      %c0_13 = arith.constant 0 : index
      %13 = vector.load %arg5[%c0_12, %c0_13] : memref<1x128xf32, #tpu.memory_space<vmem>>, vector<1x128xf32>
      %14 = vector.broadcast %13 : vector<1x128xf32> to vector<24x128xf32>
      %15 = arith.addf %12, %14 : vector<24x128xf32>
      %cst_14 = arith.constant 0.000000e+00 : f32
      %16 = vector.broadcast %cst_14 : f32 to vector<24x128xf32>
      %17 = arith.maximumf %15, %16 : vector<24x128xf32>
      %c0_15 = arith.constant 0 : index
      %c0_16 = arith.constant 0 : index
      %18 = vector.load %arg6[%c0_15, %c0_16] : memref<24x128xf32, #tpu.memory_space<vmem>>, vector<24x128xf32>
      tpu.vector_store %arg6[%c0_15, %c0_16], %17 {strides = array<i32>} : memref<24x128xf32, #tpu.memory_space<vmem>>, vector<24x128xf32>,
    } else {
    }
    return
  }
  func.func @transform_0(%arg0: i32, %arg1: i32, %arg2: i32) -> (i32, i32) {
    %c0_i32 = arith.constant 0 : i32
    return %arg0, %arg2 : i32, i32
  }
  func.func @transform_1(%arg0: i32, %arg1: i32, %arg2: i32) -> (i32, i32) {
    %c0_i32 = arith.constant 0 : i32
    return %arg2, %arg1 : i32, i32
  }
  func.func @transform_2(%arg0: i32, %arg1: i32, %arg2: i32) -> (i32, i32) {
    %c0_i32 = arith.constant 0 : i32
    %c0_i32_0 = arith.constant 0 : i32
    return %c0_i32, %arg1 : i32, i32
  }
  func.func @transform_3(%arg0: i32, %arg1: i32, %arg2: i32) -> (i32, i32) {
    %c0_i32 = arith.constant 0 : i32
    return %arg0, %arg1 : i32, i32
  }
}

</mosaic_0001>

<bundles_post_ra>
// kernel: forward.17
= control target key start
LH: loop header
LB: loop body
LE: loop exit
PB: predicated region body
PF: predicated region fallthrough
CT: control target
= control target key end

     0   :  { %s952_s12 = smov 0   ;;  %s954_s13 = smov 0   ;;  %s1035_s0 = inlined_call_operand.vmem [shape: bf16[8,1024], index: 0, kind: input, shape index: {}]   ;;  %s1036_s1 = inlined_call_operand.vmem [shape: bf16[1024,128], index: 1, kind: input, shape index: {}]   ;;  %s1037_s2 = inlined_call_operand.vmem [shape: f32[1,128], index: 2, kind: input, shape index: {}]   ;;  %s1038_s3 = inlined_call_operand.vmem [shape: f32[8,128], index: 3, kind: output, shape index: {}]  }
   0x1   :  { %s956_s14 = smov 0  }
   0x2 LB: > { %s25_s15 = sadd.s32 1, %s925_s13  ;;  %p711_p0 = scmp.ge.s32.totalorder %s929_s14, 1  ;;  %s929_s14 = sphi %s956_s14, %s13_s14   ;;  %s925_s13 = sphi %s954_s13, %s1040_s13   ;;  %s921_s12 = sphi %s952_s12, %s1039_s12  }
   0x3   : > { %p26_p1 = scmp.ge.s32.totalorder %s25_s15, 2  ;;  %p189_p2 = scmp.lt.s32.totalorder %s929_s14, 3 }
   0x5   : > { %s1042_s15 = smov (%p26_p1, %s25_s15), 0  ;;  %p190_p3 = pnand %p711_p0, %p189_p2 }
   0x6   : > { %s712_s16 = sshll.u32 (!%p190_p3), %s921_s12, 2  ;;  %s714_s17 = sshll.u32 (!%p190_p3), %s921_s12, 6 }
   0x7   : > { %193 = sbr.rel (%p190_p3) target bundleno = 205 (0xcd), region = 32  ;;  %p233_p4 = scmp.lt.s32.totalorder (!%p190_p3), %s712_s16, 7 }
   0x8   : > { %p241_p5 = scmp.lt.s32.totalorder (!%p190_p3), %s714_s17, 127  ;;  %p716_p6 = scmp.ne.s32.totalorder (!%p190_p3), %s921_s12, 0 }
   0xc   : > { %s1044_s16 = smov (!%p233_p4, %s712_s16), 7  ;;  %s1046_s17 = smov (!%p241_p5, %s714_s17), 127 }
   0xd   : > { %s713_s18 = sshll.u32 %s1044_s16, 2  ;;  %s715_s22 = sshll.u32 %s1046_s17, 2 }
   0xe   : > { %s977_s21 = scalar_lea.vmem %s1035_s0, %s713_s18  ;;  %s982_s25 = scalar_lea.vmem %s1036_s1, %s715_s22 }
   0xf   : > { %262 = sbr.rel (%p716_p6) target bundleno = 22 (0x16), region = 36 }
  0x14   : > { %v931_v0 = vmov 0.0  }
  0x15   : > { %263 = vst [vmem:[#allocation2] sm:$0xff] %v931_v0 }
  0x16 PF: > { %v856_v1 = vld [vmem:[%s982_s25 + $0x38] sm:$0xff]  ;;  %v855_v5 = vld [vmem:[%s982_s25 + $0x30] sm:$0xff]  ;;  %v854_v9 = vld [vmem:[%s982_s25 + $0x28] sm:$0xff]  ;;  %p845_p7 = scmp.ne.s32.totalorder %s921_s12, 1 }
  0x17   : > { %v864_v2 = vld [vmem:[%s982_s25 + $0x78] sm:$0xff]  ;;  %537 = vmatpush.bf16.msra.mxu0 %v856_v1  ;;  %v863_v6 = vld [vmem:[%s982_s25 + $0x70] sm:$0xff]  ;;  %v862_v10 = vld [vmem:[%s982_s25 + $0x68] sm:$0xff] }
  0x18   : > { %v872_v3 = vld [vmem:[%s982_s25 + $0xb8] sm:$0xff]  ;;  %550 = vmatpush.bf16.msra.mxu1 %v864_v2  ;;  %v871_v7 = vld [vmem:[%s982_s25 + $0xb0] sm:$0xff]  ;;  %v870_v11 = vld [vmem:[%s982_s25 + $0xa8] sm:$0xff] }
  0x19   : > { %v880_v4 = vld [vmem:[%s982_s25 + $0xf8] sm:$0xff]  ;;  %563 = vmatpush.bf16.msra.mxu2 %v872_v3  ;;  %v879_v8 = vld [vmem:[%s982_s25 + $0xf0] sm:$0xff]  ;;  %v878_v12 = vld [vmem:[%s982_s25 + $0xe8] sm:$0xff] }
  0x1a   : > { %576 = vmatpush.bf16.msra.mxu3 %v880_v4  ;;  %v853_v13 = vld [vmem:[%s982_s25 + $0x20] sm:$0xff]  ;;  %v852_v17 = vld [vmem:[%s982_s25 + $0x18] sm:$0xff]  ;;  %v851_v21 = vld [vmem:[%s982_s25 + $0x10] sm:$0xff] }
  0x1b   : > { %538 = vmatpush.bf16.msra.mxu0 %v855_v5  ;;  %v861_v14 = vld [vmem:[%s982_s25 + $0x60] sm:$0xff]  ;;  %v860_v18 = vld [vmem:[%s982_s25 + $0x58] sm:$0xff]  ;;  %v859_v22 = vld [vmem:[%s982_s25 + $0x50] sm:$0xff] }
  0x1c   : > { %551 = vmatpush.bf16.msra.mxu1 %v863_v6  ;;  %v869_v15 = vld [vmem:[%s982_s25 + $0xa0] sm:$0xff]  ;;  %v868_v19 = vld [vmem:[%s982_s25 + $0x98] sm:$0xff]  ;;  %v867_v23 = vld [vmem:[%s982_s25 + $0x90] sm:$0xff] }
  0x1d   : > { %564 = vmatpush.bf16.msra.mxu2 %v871_v7  ;;  %v877_v16 = vld [vmem:[%s982_s25 + $0xe0] sm:$0xff]  ;;  %v876_v20 = vld [vmem:[%s982_s25 + $0xd8] sm:$0xff]  ;;  %v875_v24 = vld [vmem:[%s982_s25 + $0xd0] sm:$0xff] }
  0x1e   : > { %577 = vmatpush.bf16.msra.mxu3 %v879_v8  ;;  %v850_v25 = vld [vmem:[%s982_s25 + $0x8] sm:$0xff]  ;;  %v265_v27 = vld [vmem:[%s977_s21] sm:$0xff] }
  0x1f   : > { %539 = vmatpush.bf16.msra.mxu0 %v854_v9  ;;  %v858_v26 = vld [vmem:[%s982_s25 + $0x48] sm:$0xff]  ;;  %v333_v31 = vunpack.c.l.b16 %v265_v27  ;;  %v334_v32 = vunpack.c.h.b16 %v265_v27  ;;  %v849_v33 = vld [vmem:[%s982_s25] sm:$0xff] }
  0x20   : > { %552 = vmatpush.bf16.msra.mxu1 %v862_v10  ;;  %v866_v28 = vld [vmem:[%s982_s25 + $0x88] sm:$0xff]  ;;  %v857_v34 = vld [vmem:[%s982_s25 + $0x40] sm:$0xff] }
  0x21   : > { %565 = vmatpush.bf16.msra.mxu2 %v870_v11  ;;  %v874_v29 = vld [vmem:[%s982_s25 + $0xc8] sm:$0xff]  ;;  %v865_v37 = vld [vmem:[%s982_s25 + $0x80] sm:$0xff]  ;;  %v337_v39 = vpack.c.b16 %v333_v31, %v333_v31  ;;  %v338_v40 = vpack.c.b16 %v334_v32, %v334_v32 }
  0x22   : > { %578 = vmatpush.bf16.msra.mxu3 %v878_v12  ;;  %v266_v30 = vld [vmem:[%s977_s21 + $0x8] sm:$0xff]  ;;  %v873_v38 = vld [vmem:[%s982_s25 + $0xc0] sm:$0xff] }
  0x23   : > { %540 = vmatpush.bf16.msra.mxu0 %v853_v13  ;;  %v335_v35 = vunpack.c.l.b16 %v266_v30  ;;  %v336_v36 = vunpack.c.h.b16 %v266_v30  ;;  %v264_v51 = vld [vmem:[#allocation2] sm:$0xff] }
  0x24   : > { %553 = vmatpush.bf16.msra.mxu1 %v861_v14 }
  0x25   : > { %566 = vmatpush.bf16.msra.mxu2 %v869_v15  ;;  %v339_v41 = vpack.c.b16 %v335_v35, %v335_v35  ;;  %v340_v42 = vpack.c.b16 %v336_v36, %v336_v36 }
  0x26   : > { %579 = vmatpush.bf16.msra.mxu3 %v877_v16 }
  0x27   : > { %541 = vmatpush.bf16.msra.mxu0 %v852_v17 }
  0x28   : > { %554 = vmatpush.bf16.msra.mxu1 %v860_v18 }
  0x29   : > { %567 = vmatpush.bf16.msra.mxu2 %v868_v19 }
  0x2a   : > { %580 = vmatpush.bf16.msra.mxu3 %v876_v20 }
  0x2b   : > { %542 = vmatpush.bf16.msra.mxu0 %v851_v21 }
  0x2c   : > { %555 = vmatpush.bf16.msra.mxu1 %v859_v22 }
  0x2d   : > { %568 = vmatpush.bf16.msra.mxu2 %v867_v23 }
  0x2e   : > { %581 = vmatpush.bf16.msra.mxu3 %v875_v24 }
  0x2f   : > { %543 = vmatpush.bf16.msra.mxu0 %v850_v25 }
  0x30   : > { %556 = vmatpush.bf16.msra.mxu1 %v858_v26 }
  0x31   : > { %569 = vmatpush.bf16.msra.mxu2 %v866_v28 }
  0x32   : > { %582 = vmatpush.bf16.msra.mxu3 %v874_v29 }
  0x33   : > { %544 = vmatpush.bf16.msra.mxu0 %v849_v33 }
  0x34   : > { %557 = vmatpush.bf16.msra.mxu1 %v857_v34 }
  0x35   : > { %570 = vmatpush.bf16.msra.mxu2 %v865_v37 }
  0x36   : > { %583 = vmatpush.bf16.msra.mxu3 %v873_v38  ;;  %545 = vmatmul.bf16.vlgmr.msra.gmra.mxu0 %v337_v39 }
  0x37   : > { %558 = vmatmul.bf16.vlgmr.msra.gmra.mxu1 %v338_v40 }
  0x38   : > { %571 = vmatmul.bf16.vlgmr.msra.gmra.mxu2 %v339_v41 }
  0x39   : > { %584 = vmatmul.bf16.vlgmr.msra.gmra.mxu3 %v340_v42 }
  0xb3   : > { %v546_v43 = vpop.f32.mrf.mxu0 }
  0xb4   : > { %v559_v44 = vpop.f32.mrf.mxu1 }
  0xb5   : > { %v560_v45 = vadd.f32 %v559_v44, %v546_v43 }
  0xbb   : > { %v572_v46 = vpop.f32.mrf.mxu2  ;;  %v548_v49 = vpop.f32.mrf.mxu0 }
  0xbc   : > { %v585_v47 = vpop.f32.mrf.mxu3  ;;  %v573_v48 = vadd.f32 %v572_v46, %v560_v45  ;;  %v561_v50 = vpop.f32.mrf.mxu1 }
  0xbe   : > { %v586_v52 = vadd.f32 %v585_v47, %v573_v48 }
  0xc0   : > { %v589_v53 = vadd.f32 %v586_v52, %v264_v51  ;;  %594 = sbr.rel (%p845_p7) target bundleno = 205 (0xcd), region = 40 }
  0xc2   : > { %590 = vst [vmem:[#allocation2] sm:$0xff] %v589_v53 }
  0xc3   : > { %v574_v54 = vpop.f32.mrf.mxu2 }
  0xc4   : > { %v587_v55 = vpop.f32.mrf.mxu3 }
  0xc5   : > { %v906_v57 = vld [vmem:[%s1037_s2] ss:$0 sm:$0xff] }
  0xc9   : > { %v595_v56 = vld [vmem:[#allocation2] sm:$0xff] }
  0xca   : > { %v600_v58 = vadd.f32 %v906_v57, %v595_v56 }
  0xcc   : > { %601 = vst [vmem:[%s1038_s3] sm:$0xff] %v600_v58 }
  0xcd PF: > { %s13_s14 = sadd.s32 1, %s929_s14   ;;  %s1039_s12 = smov %s925_s13 }
  0xce   : > { %p10_p8 = scmp.ge.s32.totalorder %s13_s14, 4   ;;  %s1040_s13 = smov %s1042_s15 }
  0xd0   :  { %12 = sbr.rel (!%p10_p8) target bundleno = 2 (0x2), region = 76 }

// kernel: forward.18
= control target key start
LH: loop header
LB: loop body
LE: loop exit
PB: predicated region body
PF: predicated region fallthrough
CT: control target
= control target key end

     0   :  { %s208_s1 = inlined_call_operand.vmem [shape: bf16[128,128], index: 1, kind: input, shape index: {}]   ;;  %s209_s2 = inlined_call_operand.vmem [shape: f32[1,128], index: 2, kind: input, shape index: {}]   ;;  %s210_s0 = inlined_call_operand.vmem [shape: bf16[8,128], index: 0, kind: input, shape index: {}]   ;;  %s211_s3 = inlined_call_operand.vmem [shape: f32[8,128], index: 3, kind: output, shape index: {}]  }
   0x1   :  { %v153_v0 = vld [vmem:[%s208_s1 + $0x38] sm:$0xff]  ;;  %v152_v1 = vld [vmem:[%s208_s1 + $0x30] sm:$0xff]  ;;  %v151_v2 = vld [vmem:[%s208_s1 + $0x28] sm:$0xff] }
   0x2   :  { %85 = vmatpush.bf16.msra.mxu0 %v153_v0  ;;  %v150_v3 = vld [vmem:[%s208_s1 + $0x20] sm:$0xff]  ;;  %v149_v4 = vld [vmem:[%s208_s1 + $0x18] sm:$0xff]  ;;  %v148_v5 = vld [vmem:[%s208_s1 + $0x10] sm:$0xff] }
   0x3   :  { %v147_v6 = vld [vmem:[%s208_s1 + $0x8] sm:$0xff]  ;;  %v146_v7 = vld [vmem:[%s208_s1] sm:$0xff] }
   0x4   :  { %v20_v8 = vld [vmem:[%s210_s0] sm:$0xf] }
   0x5   :  { %v154_v9 = vld [vmem:[%s209_s2] ss:$0 sm:$0xff] }
   0x6   :  { %86 = vmatpush.bf16.msra.mxu0 %v152_v1 }
   0xa   :  { %87 = vmatpush.bf16.msra.mxu0 %v151_v2 }
   0xe   :  { %88 = vmatpush.bf16.msra.mxu0 %v150_v3 }
  0x12   :  { %89 = vmatpush.bf16.msra.mxu0 %v149_v4 }
  0x16   :  { %90 = vmatpush.bf16.msra.mxu0 %v148_v5 }
  0x1a   :  { %91 = vmatpush.bf16.msra.mxu0 %v147_v6 }
  0x1e   :  { %92 = vmatpush.bf16.msra.mxu0 %v146_v7 }
  0x21   :  { %93 = vmatmul.bf16.vlgmr.msra.gmra.mxu0 %v20_v8 }
  0x9e   :  { %v94_v10 = vpop.f32.mrf.mxu0 }
  0x9f   :  { %v108_v11 = vadd.f32 %v154_v9, %v94_v10 }
  0xa1   :  { %109 = vst [vmem:[%s211_s3] sm:$0xff] %v108_v11 }
  0xa6   :  { %v96_v12 = vpop.f32.mrf.mxu0 }

// kernel: forward.19
= control target key start
LH: loop header
LB: loop body
LE: loop exit
PB: predicated region body
PF: predicated region fallthrough
CT: control target
= control target key end

     0   :  { %s261_s1 = inlined_call_operand.vmem [shape: bf16[128,128], index: 1, kind: input, shape index: {}]   ;;  %s262_s2 = inlined_call_operand.vmem [shape: f32[1,128], index: 2, kind: input, shape index: {}]   ;;  %s263_s0 = inlined_call_operand.vmem [shape: bf16[24,128], index: 0, kind: input, shape index: {}]   ;;  %s264_s3 = inlined_call_operand.vmem [shape: f32[24,128], index: 3, kind: output, shape index: {}]  }
   0x1   :  { %v189_v0 = vld [vmem:[%s261_s1 + $0x38] sm:$0xff]  ;;  %v188_v1 = vld [vmem:[%s261_s1 + $0x30] sm:$0xff]  ;;  %v187_v2 = vld [vmem:[%s261_s1 + $0x28] sm:$0xff] }
   0x2   :  { %101 = vmatpush.bf16.msra.mxu0 %v189_v0  ;;  %190 = vmatpush.bf16.msra.mxu1 %v189_v0  ;;  %v186_v3 = vld [vmem:[%s261_s1 + $0x20] sm:$0xff]  ;;  %v185_v4 = vld [vmem:[%s261_s1 + $0x18] sm:$0xff]  ;;  %v184_v5 = vld [vmem:[%s261_s1 + $0x10] sm:$0xff] }
   0x3   :  { %v183_v6 = vld [vmem:[%s261_s1 + $0x8] sm:$0xff]  ;;  %v182_v9 = vld [vmem:[%s261_s1] sm:$0xff] }
   0x4   :  { %v26_v7 = vld [vmem:[%s263_s0 + $0x8] sm:$0xf]  ;;  %v181_v10 = vld [vmem:[%s263_s0] sm:$0xff] }
   0x5   :  { %v48_v8 = vunpack.c.l.b16 %v26_v7  ;;  %v198_v12 = vld [vmem:[%s262_s2] ss:$0 sm:$0xff] }
   0x6   :  { %102 = vmatpush.bf16.msra.mxu0 %v188_v1  ;;  %191 = vmatpush.bf16.msra.mxu1 %v188_v1 }
   0x7   :  { %v50_v11 = vpack.c.b16 %v48_v8, %v48_v8 }
   0xa   :  { %103 = vmatpush.bf16.msra.mxu0 %v187_v2  ;;  %192 = vmatpush.bf16.msra.mxu1 %v187_v2 }
   0xe   :  { %104 = vmatpush.bf16.msra.mxu0 %v186_v3  ;;  %193 = vmatpush.bf16.msra.mxu1 %v186_v3 }
  0x12   :  { %105 = vmatpush.bf16.msra.mxu0 %v185_v4  ;;  %194 = vmatpush.bf16.msra.mxu1 %v185_v4 }
  0x16   :  { %106 = vmatpush.bf16.msra.mxu0 %v184_v5  ;;  %195 = vmatpush.bf16.msra.mxu1 %v184_v5 }
  0x1a   :  { %107 = vmatpush.bf16.msra.mxu0 %v183_v6  ;;  %196 = vmatpush.bf16.msra.mxu1 %v183_v6 }
  0x1e   :  { %108 = vmatpush.bf16.msra.mxu0 %v182_v9  ;;  %197 = vmatpush.bf16.msra.mxu1 %v182_v9 }
  0x21   :  { %109 = vmatmul.bf16.vlgmr.msra.gmra.mxu0 %v181_v10  ;;  %114 = vmatmul.bf16.vlgmr.msra.gmra.mxu1 %v50_v11 }
  0x9e   :  { %v110_v13 = vpop.f32.mrf.mxu0  ;;  %v115_v14 = vpop.f32.mrf.mxu1 }
  0x9f   :  { %v135_v15 = vadd.f32 %v198_v12, %v110_v13  ;;  %v137_v16 = vadd.f32 %v198_v12, %v115_v14 }
  0xa1   :  { %138 = vst [vmem:[%s264_s3] sm:$0xff] %v135_v15 }
  0xa2   :  { %140 = vst [vmem:[%s264_s3 + $0x10] sm:$0xff] %v137_v16 }
  0xa6   :  { %v112_v17 = vpop.f32.mrf.mxu0  ;;  %v117_v18 = vpop.f32.mrf.mxu1 }
  0xa7   :  { %v136_v19 = vadd.f32 %v198_v12, %v112_v17 }
  0xa9   :  { %139 = vst [vmem:[%s264_s3 + $0x8] sm:$0xff] %v136_v19 }

// kernel: forward.22
= control target key start
LH: loop header
LB: loop body
LE: loop exit
PB: predicated region body
PF: predicated region fallthrough
CT: control target
= control target key end

     0   :  { %vm26_vm0 = vcmask 261120   ;;  %v132_v12 = vmov 32.0   ;;  %s200_s0 = inlined_call_operand.vmem [shape: f32[24,32], index: 0, kind: input, shape index: {}]   ;;  %s201_s1 = inlined_call_operand.vmem [shape: f32[24,32], index: 1, kind: input, shape index: {}]   ;;  %s202_s2 = inlined_call_operand.vmem [shape: f32[1,32], index: 2, kind: input, shape index: {}]   ;;  %s203_s3 = inlined_call_operand.vmem [shape: f32[1,32], index: 3, kind: input, shape index: {}]   ;;  %s204_s4 = inlined_call_operand.vmem [shape: f32[24,32], index: 4, kind: output, shape index: {}]  }
   0x1   :  { %v17_v0 = vld [vmem:[%s200_s0] sm:$0xff]  ;;  %v19_v3 = vld [vmem:[%s200_s0 + $0x10] sm:$0xff]  ;;  %v18_v5 = vld [vmem:[%s200_s0 + $0x8] sm:$0xff]  ;;  %124 = vrcp.f32 %v132_v12 }
   0x2   :  { %v20_v1 = vld [vmem:[%s201_s1] sm:$0xff]  ;;  %v22_v4 = vld [vmem:[%s201_s1 + $0x10] sm:$0xff]  ;;  %v21_v6 = vld [vmem:[%s201_s1 + $0x8] sm:$0xff] }
   0x3   :  { %v23_v2 = vadd.f32 %v20_v1, %v17_v0  ;;  %v25_v7 = vadd.f32 %v22_v4, %v19_v3  ;;  %v24_v10 = vadd.f32 %v21_v6, %v18_v5  ;;  %v122_v51 = vld [vmem:[%s202_s2] ss:$0 sm:$0xff] }
   0x4   :  { %v123_v54 = vld [vmem:[%s203_s3] ss:$0 sm:$0xff] }
   0x5   :  { %v27_v8 = vsel %vm26_vm0, %v23_v2, 0.0  ;;  %v33_v9 = vsel %vm26_vm0, %v25_v7, 0.0  ;;  %v30_v11 = vsel %vm26_vm0, %v24_v10, 0.0 }
   0x6   :  { %28 = vadd.xlane.f32.xlu0 %v27_v8  ;;  %34 = vadd.xlane.f32.xlu1 %v33_v9 }
   0x7   :  { %v125_v13 = vpop.eup %124 }
   0x8   :  { %v37_v14 = vmul.f32 32.0, %v125_v13  ;;  %vm41_vm1 = vweird.f32 %v125_v13 }
   0xa   :  { %v38_v15 = vsub.f32 1.0, %v37_v14 }
   0xc   :  { %v39_v16 = vmul.f32 %v125_v13, %v38_v15 }
   0xe   :  { %31 = vadd.xlane.f32.xlu0 %v30_v11  ;;  %v40_v17 = vadd.f32 %v125_v13, %v39_v16 }
  0x10   :  { %v42_v18 = vsel %vm41_vm1, %v125_v13, %v40_v17 }
  0x79   :  { %v29_v19 = vpop.xlane.xlu0 %28  ;;  %v35_v23 = vpop.xlane.xlu1 %34 }
  0x7a   :  { %v43_v20 = vmul.f32 %v42_v18, %v29_v19  ;;  %v45_v27 = vmul.f32 %v42_v18, %v35_v23 }
  0x7c   :  { %v46_v21 = vsub.f32 %v23_v2, %v43_v20  ;;  %v48_v29 = vsub.f32 %v25_v7, %v45_v27 }
  0x7e   :  { %v49_v22 = vmul.f32 %v46_v21, %v46_v21  ;;  %v51_v32 = vmul.f32 %v48_v29, %v48_v29 }
  0x80   :  { %v52_v24 = vsel %vm26_vm0, %v49_v22, 0.0  ;;  %v58_v33 = vsel %vm26_vm0, %v51_v32, 0.0 }
  0x81   :  { %53 = vadd.xlane.f32.xlu1 %v52_v24  ;;  %v32_v25 = vpop.xlane.xlu0 %31 }
  0x82   :  { %v44_v26 = vmul.f32 %v42_v18, %v32_v25 }
  0x84   :  { %v47_v28 = vsub.f32 %v24_v10, %v44_v26 }
  0x86   :  { %v50_v30 = vmul.f32 %v47_v28, %v47_v28 }
  0x88   :  { %v55_v31 = vsel %vm26_vm0, %v50_v30, 0.0 }
  0x89   :  { %56 = vadd.xlane.f32.xlu2 %v55_v31 }
  0x91   :  { %59 = vadd.xlane.f32.xlu2 %v58_v33 }
  0xf4   :  { %v54_v34 = vpop.xlane.xlu1 %53 }
  0xf5   :  { %v61_v35 = vmul.f32 %v54_v34, %v42_v18 }
  0xf7   :  { %v64_v36 = vadd.f32 1e-05, %v61_v35 }
  0xf9   :  { %126 = vrsqrt.f32 %v64_v36  ;;  %vm73_vm3 = vweird.f32 %v64_v36 }
  0xfc   :  { %v57_v37 = vpop.xlane.xlu2 %56 }
  0xfd   :  { %v62_v38 = vmul.f32 %v57_v37, %v42_v18 }
  0xff   :  { %v127_v39 = vpop.eup %126  ;;  %v65_v40 = vadd.f32 1e-05, %v62_v38 }
 0x100   :  { %v68_v41 = vmul.f32 %v127_v39, %v64_v36  ;;  %vm74_vm2 = vweird.f32 %v127_v39 }
 0x101   :  { %128 = vrsqrt.f32 %v65_v40  ;;  %vm75_vm4 = vmor %vm73_vm3, %vm74_vm2  ;;  %vm83_vm6 = vweird.f32 %v65_v40 }
 0x102   :  { %v69_v42 = vmul.f32 %v127_v39, %v68_v41 }
 0x104   :  { %v70_v43 = vmul.f32 0.5, %v69_v42  ;;  %v60_v44 = vpop.xlane.xlu2 %59 }
 0x105   :  { %v63_v45 = vmul.f32 %v60_v44, %v42_v18 }
 0x106   :  { %v71_v46 = vsub.f32 1.5, %v70_v43 }
 0x107   :  { %v129_v47 = vpop.eup %128  ;;  %v66_v48 = vadd.f32 1e-05, %v63_v45 }
 0x108   :  { %v72_v49 = vmul.f32 %v127_v39, %v71_v46  ;;  %v78_v50 = vmul.f32 %v129_v47, %v65_v40  ;;  %vm84_vm5 = vweird.f32 %v129_v47 }
 0x109   :  { %130 = vrsqrt.f32 %v66_v48  ;;  %vm85_vm7 = vmor %vm83_vm6, %vm84_vm5  ;;  %vm93_vm9 = vweird.f32 %v66_v48 }
 0x10a   :  { %v76_v52 = vsel %vm75_vm4, %v127_v39, %v72_v49  ;;  %v79_v53 = vmul.f32 %v129_v47, %v78_v50 }
 0x10b   :  { %v97_v55 = vmul.f32 %v76_v52, %v46_v21 }
 0x10c   :  { %v80_v56 = vmul.f32 0.5, %v79_v53 }
 0x10d   :  { %v104_v57 = vmul.f32 %v122_v51, %v97_v55 }
 0x10e   :  { %v81_v58 = vsub.f32 1.5, %v80_v56 }
 0x10f   :  { %v131_v59 = vpop.eup %130  ;;  %v111_v60 = vadd.f32 %v123_v54, %v104_v57 }
 0x110   :  { %v82_v61 = vmul.f32 %v129_v47, %v81_v58  ;;  %v88_v62 = vmul.f32 %v131_v59, %v66_v48  ;;  %vm94_vm8 = vweird.f32 %v131_v59 }
 0x111   :  { %114 = vst.msk [vmem:[%s204_s4] sm:$0xff] %vm26_vm0, %v111_v60  ;;  %vm95_vm10 = vmor %vm93_vm9, %vm94_vm8 }
 0x112   :  { %v86_v63 = vsel %vm85_vm7, %v129_v47, %v82_v61  ;;  %v89_v0 = vmul.f32 %v131_v59, %v88_v62 }
 0x113   :  { %v98_v1 = vmul.f32 %v86_v63, %v47_v28 }
 0x114   :  { %v90_v2 = vmul.f32 0.5, %v89_v0 }
 0x115   :  { %v105_v3 = vmul.f32 %v122_v51, %v98_v1 }
 0x116   :  { %v91_v4 = vsub.f32 1.5, %v90_v2 }
 0x117   :  { %v112_v5 = vadd.f32 %v123_v54, %v105_v3 }
 0x118   :  { %v92_v6 = vmul.f32 %v131_v59, %v91_v4 }
 0x119   :  { %115 = vst.msk [vmem:[%s204_s4 + $0x8] sm:$0xff] %vm26_vm0, %v112_v5 }
 0x11a   :  { %v96_v7 = vsel %vm95_vm10, %v131_v59, %v92_v6 }
 0x11b   :  { %v99_v8 = vmul.f32 %v96_v7, %v48_v29 }
 0x11d   :  { %v106_v9 = vmul.f32 %v122_v51, %v99_v8 }
 0x11f   :  { %v113_v10 = vadd.f32 %v123_v54, %v106_v9 }
 0x121   :  { %116 = vst.msk [vmem:[%s204_s4 + $0x10] sm:$0xff] %vm26_vm0, %v113_v10 }

// kernel: forward.20
= control target key start
LH: loop header
LB: loop body
LE: loop exit
PB: predicated region body
PF: predicated region fallthrough
CT: control target
= control target key end

     0   :  { %s919_s15 = smov 0   ;;  %s1024_s0 = inlined_call_operand.vmem [shape: f32[2,1,9], index: 0, kind: input, shape index: {}]   ;;  %s1025_s1 = inlined_call_operand.vmem [shape: bf16[2,4,9,8], index: 1, kind: input, shape index: {}]   ;;  %s1026_s2 = inlined_call_operand.vmem [shape: bf16[2,4,9,8], index: 2, kind: input, shape index: {}]   ;;  %s1027_s3 = inlined_call_operand.vmem [shape: bf16[2,4,9,8], index: 3, kind: input, shape index: {}]   ;;  %s1028_s4 = inlined_call_operand.vmem [shape: f32[2,4,9,8], index: 4, kind: output, shape index: {}]  }
   0x1 LB: > { %s754_s16 = sadd.s32 4294967295, %s890_s15   ;;  %p758_p0 = scmp.ge.s32.totalorder %s890_s15, 1  ;;  %s890_s15 = sphi %s919_s15, %s14_s15  }
   0x2   : > { %p190_p1 = scmp.lt.s32.totalorder %s890_s15, 3 }
   0x4   : > { %p191_p2 = pnand %p758_p0, %p190_p1 }
   0x5   : > { %p229_p3 = scmp.lt.s32.totalorder (!%p191_p2), %s754_s16, 1 }
   0x6   : > { %194 = sbr.rel (%p191_p2) target bundleno = 577 (0x241), region = 36 }
   0xb   : > { %s1030_s16 = smov (!%p229_p3, %s754_s16), 1  ;;  %vm287_vm0 = vcmask 64512   ;;  %v406_v28 = vlaneseq  ;;  %v892_v32 = vmov -1e+10   ;;  %vm435_vm2 = vcmask 72704  }
   0xc   : > { %s231_s19 = scalar_lea.vmem %s1024_s0, %s1030_s16  ;;  %s934_s20 = sshll.u32 %s1030_s16, 5  ;;  %vm439_vm4 = vcmask 65536   ;;  %vm546_vm5 = vcmask 1043456   ;;  %vm547_vm6 = vcmask 1044480   ;;  %vm658_vm7 = vcmask 57344  }
   0xd   : > { %s241_s23 = scalar_lea.vmem %s1026_s2, %s934_s20  ;;  %s236_s26 = scalar_lea.vmem %s1025_s1, %s934_s20  ;;  %v407_v29 = vshrl.u32 %v406_v28, 7  ;;  %v410_v30 = vand.u32 127, %v406_v28  ;;  %v851_v34 = vld [vmem:[%s231_s19] ss:$0 sm:$0xff] }
   0xe   : > { %v773_v0 = vld [vmem:[%s241_s23] sm:$0xf]  ;;  %v833_v1 = vld [vmem:[%s241_s23] sm:$0x10]  ;;  %v791_v2 = vld [vmem:[%s241_s23 + $0x10] sm:$0xf]  ;;  %s246_s5 = scalar_lea.vmem %s1027_s3, %s934_s20 }
   0xf   : > { %v774_v3 = vor.u32 %v833_v1, %v773_v0  ;;  %v835_v4 = vld [vmem:[%s241_s23 + $0x10] sm:$0x10]  ;;  %v800_v5 = vld [vmem:[%s241_s23 + $0x18] sm:$0xf]  ;;  %v836_v6 = vld [vmem:[%s241_s23 + $0x18] sm:$0x10]  ;;  %vm411_vm1 = vcmp.le.s32.totalorder %v410_v30, %v407_v29 }
  0x10   : > { %v792_v7 = vor.u32 %v835_v4, %v791_v2  ;;  %v801_v8 = vor.u32 %v836_v6, %v800_v5  ;;  %v782_v9 = vld [vmem:[%s241_s23 + $0x8] sm:$0xf]  ;;  %v834_v10 = vld [vmem:[%s241_s23 + $0x8] sm:$0x10]  ;;  %v769_v13 = vld [vmem:[%s236_s26] sm:$0xf] }
  0x11   : > { %v292_v11 = vsel %vm287_vm0, %v774_v3, 0  ;;  %v783_v12 = vor.u32 %v834_v10, %v782_v9  ;;  %v829_v14 = vld [vmem:[%s236_s26] sm:$0x10]  ;;  %v787_v17 = vld [vmem:[%s236_s26 + $0x10] sm:$0xf]  ;;  %v413_v33 = vsel %vm411_vm1, 0.0, %v892_v32 }
  0x12   : > { %301 = vmatpush.bf16.xpose.msra.mxu0 %v292_v11  ;;  %v352_v15 = vsel %vm287_vm0, %v792_v7, 0  ;;  %v382_v16 = vsel %vm287_vm0, %v801_v8, 0  ;;  %v831_v18 = vld [vmem:[%s236_s26 + $0x10] sm:$0x10]  ;;  %v796_v20 = vld [vmem:[%s236_s26 + $0x18] sm:$0xf]  ;;  %v770_v24 = vor.u32 %v829_v14, %v769_v13 }
  0x13   : > { %361 = vmatpush.bf16.xpose.msra.mxu2 %v352_v15  ;;  %391 = vmatpush.bf16.xpose.msra.mxu3 %v382_v16  ;;  %v322_v19 = vsel %vm287_vm0, %v783_v12, 0  ;;  %v832_v21 = vld [vmem:[%s236_s26 + $0x18] sm:$0x10]  ;;  %v778_v22 = vld [vmem:[%s236_s26 + $0x8] sm:$0xf]  ;;  %v788_v25 = vor.u32 %v831_v18, %v787_v17  ;;  %v408_v36 = vadd.s32 8, %v407_v29 }
  0x14   : > { %331 = vmatpush.bf16.xpose.msra.mxu1 %v322_v19  ;;  %v830_v23 = vld [vmem:[%s236_s26 + $0x8] sm:$0x10]  ;;  %v797_v26 = vor.u32 %v832_v21, %v796_v20  ;;  %s828_s6 = sshll.u32 %s1030_s16, 6 }
  0x15   : > { %v779_v27 = vor.u32 %v830_v23, %v778_v22  ;;  %vm412_vm3 = vcmp.le.s32.totalorder %v410_v30, %v408_v36  ;;  %s251_s9 = scalar_lea.vmem %s1028_s4, %s828_s6 }
  0x16   : > { %v414_v46 = vsel %vm412_vm3, 0.0, %v892_v32 }
  0x19   : > { %775 = vmatmul.msk.bf16.vlgmr.msra.gmra.mxu0 %vm287_vm0, %v770_v24 }
  0x1a   : > { %793 = vmatmul.msk.bf16.vlgmr.msra.gmra.mxu2 %vm287_vm0, %v788_v25  ;;  %802 = vmatmul.msk.bf16.vlgmr.msra.gmra.mxu3 %vm287_vm0, %v797_v26 }
  0x1b   : > { %784 = vmatmul.msk.bf16.vlgmr.msra.gmra.mxu1 %vm287_vm0, %v779_v27 }
  0x96   : > { %v303_v31 = vpop.f32.mrf.mxu0 }
  0x97   : > { %v398_v35 = vmul.f32 0.35355338, %v303_v31 }
  0x98   : > { %v333_v38 = vpop.f32.mrf.mxu1 }
  0x99   : > { %v415_v37 = vadd.f32 %v413_v33, %v398_v35  ;;  %v400_v62 = vmul.f32 0.35355338, %v333_v38 }
  0x9b   : > { %v427_v39 = vadd.f32 %v851_v34, %v415_v37  ;;  %v417_v4 = vadd.f32 %v413_v33, %v400_v62  ;;  %v837_v62 = vld [vmem:[%s246_s5] sm:$0x10] }
  0x9d   : > { %v363_v40 = vpop.f32.mrf.mxu2  ;;  %v393_v41 = vpop.f32.mrf.mxu3  ;;  %v436_v42 = vsel %vm435_vm2, %v427_v39, -inf  ;;  %v429_v9 = vadd.f32 %v851_v34, %v417_v4 }
  0x9e   : > { %v402_v43 = vmul.f32 0.35355338, %v363_v40  ;;  %v404_v44 = vmul.f32 0.35355338, %v393_v41  ;;  %v305_v45 = vpop.f32.mrf.mxu0  ;;  %437 = vmax.xlane.f32.xlu2 %v436_v42 }
  0x9f   : > { %v399_v47 = vmul.f32 0.35355338, %v305_v45  ;;  %v443_v11 = vsel %vm435_vm2, %v429_v9, -inf }
  0xa0   : > { %v419_v48 = vadd.f32 %v413_v33, %v402_v43  ;;  %v421_v49 = vadd.f32 %v413_v33, %v404_v44  ;;  %v335_v54 = vpop.f32.mrf.mxu1 }
  0xa1   : > { %v416_v50 = vadd.f32 %v414_v46, %v399_v47  ;;  %v401_v63 = vmul.f32 0.35355338, %v335_v54  ;;  %v893_v54 = vmov 65535  }
  0xa2   : > { %v433_v51 = vadd.f32 %v851_v34, %v421_v49  ;;  %v431_v52 = vadd.f32 %v851_v34, %v419_v48 }
  0xa3   : > { %v428_v53 = vadd.f32 %v851_v34, %v416_v50  ;;  %v418_v5 = vadd.f32 %v414_v46, %v401_v63 }
  0xa4   : > { %v455_v55 = vsel %vm435_vm2, %v433_v51, -inf  ;;  %v449_v56 = vsel %vm435_vm2, %v431_v52, -inf }
  0xa5   : > { %v365_v57 = vpop.f32.mrf.mxu2  ;;  %v395_v58 = vpop.f32.mrf.mxu3  ;;  %456 = vmax.xlane.f32.xlu1 %v455_v55  ;;  %450 = vmax.xlane.f32.xlu0 %v449_v56  ;;  %v440_v59 = vsel %vm439_vm4, %v428_v53, -inf  ;;  %v430_v8 = vadd.f32 %v851_v34, %v418_v5  ;;  %v548_v55 = vsel %vm546_vm5, 4294967295, %v893_v54 }
  0xa6   : > { %v403_v60 = vmul.f32 0.35355338, %v365_v57  ;;  %v405_v61 = vmul.f32 0.35355338, %v395_v58  ;;  %441 = vmax.xlane.f32.xlu2 %v440_v59  ;;  %v820_v57 = vld [vmem:[%s246_s5 + $0x18] sm:$0xf] }
  0xa7   : > { %v446_v10 = vsel %vm439_vm4, %v430_v8, -inf  ;;  %v840_v58 = vld [vmem:[%s246_s5 + $0x18] sm:$0x10]  ;;  %v549_v59 = vsel %vm547_vm6, %v548_v55, 0 }
  0xa8   : > { %v420_v0 = vadd.f32 %v414_v46, %v403_v60  ;;  %v422_v1 = vadd.f32 %v414_v46, %v405_v61  ;;  %v821_v60 = vor.u32 %v840_v58, %v820_v57  ;;  %v805_v61 = vld [vmem:[%s246_s5] sm:$0xf] }
  0xaa   : > { %v434_v2 = vadd.f32 %v851_v34, %v422_v1  ;;  %v432_v3 = vadd.f32 %v851_v34, %v420_v0  ;;  %v806_v0 = vor.u32 %v837_v62, %v805_v61  ;;  %v641_v1 = vand.u32 %v821_v60, %v549_v59 }
  0xac   : > { %v458_v6 = vsel %vm439_vm4, %v434_v2, -inf  ;;  %v452_v7 = vsel %vm439_vm4, %v432_v3, -inf  ;;  %v551_v4 = vand.u32 %v806_v0, %v549_v59  ;;  %650 = vmatpush.bf16.msrb.mxu3 %v641_v1 }
  0xad   : > { %459 = vmax.xlane.f32.xlu1 %v458_v6  ;;  %453 = vmax.xlane.f32.xlu0 %v452_v7 }
  0xae   : > { %560 = vmatpush.bf16.msrb.mxu0 %v551_v4 }
  0xb5   : > { %447 = vmax.xlane.f32.xlu1 %v446_v10  ;;  %444 = vmax.xlane.f32.xlu0 %v443_v11 }
 0x111   : > { %v438_v12 = vpop.xlane.xlu2 %437 }
 0x112   : > { %v461_v13 = vsub.f32 %v427_v39, %v438_v12 }
 0x114   : > { %v469_v14 = vmul.f32 1.442695, %v461_v13 }
 0x116   : > { %852 = vpow2.f32 %v469_v14 }
 0x118   : > { %v457_v15 = vpop.xlane.xlu1 %456  ;;  %v451_v16 = vpop.xlane.xlu0 %450 }
 0x119   : > { %v467_v17 = vsub.f32 %v433_v51, %v457_v15  ;;  %v465_v18 = vsub.f32 %v431_v52, %v451_v16  ;;  %v442_v19 = vpop.xlane.xlu2 %441  ;;  %v815_v52 = vld [vmem:[%s246_s5 + $0x10] sm:$0xf] }
 0x11a   : > { %v462_v22 = vsub.f32 %v428_v53, %v442_v19  ;;  %v839_v53 = vld [vmem:[%s246_s5 + $0x10] sm:$0x10] }
 0x11b   : > { %v481_v20 = vmul.f32 1.442695, %v467_v17  ;;  %v477_v21 = vmul.f32 1.442695, %v465_v18  ;;  %v816_v56 = vor.u32 %v839_v53, %v815_v52 }
 0x11c   : > { %v965_v23 = vpop.eup %852  ;;  %v471_v25 = vmul.f32 1.442695, %v462_v22 }
 0x11d   : > { %854 = vpow2.f32 %v481_v20  ;;  %v485_v24 = vsel %vm435_vm2, %v965_v23, 0.0  ;;  %v611_v63 = vand.u32 %v816_v56, %v549_v59 }
 0x11e   : > { %856 = vpow2.f32 %v477_v21  ;;  %486 = vadd.xlane.f32.xlu0 %v485_v24 }
 0x11f   : > { %858 = vpow2.f32 %v471_v25  ;;  %620 = vmatpush.bf16.msrb.mxu2 %v611_v63 }
 0x120   : > { %v460_v26 = vpop.xlane.xlu1 %459  ;;  %v454_v27 = vpop.xlane.xlu0 %453 }
 0x121   : > { %v468_v28 = vsub.f32 %v434_v2, %v460_v26  ;;  %v466_v29 = vsub.f32 %v432_v3, %v454_v27  ;;  %v810_v2 = vld [vmem:[%s246_s5 + $0x8] sm:$0xf]  ;;  %v838_v3 = vld [vmem:[%s246_s5 + $0x8] sm:$0x10] }
 0x122   : > { %v811_v5 = vor.u32 %v838_v3, %v810_v2 }
 0x123   : > { %v969_v30 = vpop.eup %854  ;;  %v483_v31 = vmul.f32 1.442695, %v468_v28  ;;  %v479_v32 = vmul.f32 1.442695, %v466_v29 }
 0x124   : > { %v971_v33 = vpop.eup %856  ;;  %v503_v34 = vsel %vm435_vm2, %v969_v30, 0.0  ;;  %v581_v6 = vand.u32 %v811_v5, %v549_v59 }
 0x125   : > { %860 = vpow2.f32 %v483_v31  ;;  %504 = vadd.xlane.f32.xlu1 %v503_v34  ;;  %v497_v35 = vsel %vm435_vm2, %v971_v33, 0.0  ;;  %v977_v38 = vpop.eup %858 }
 0x126   : > { %862 = vpow2.f32 %v479_v32  ;;  %498 = vadd.xlane.f32.xlu2 %v497_v35  ;;  %v488_v46 = vsel %vm439_vm4, %v977_v38, 0.0  ;;  %590 = vmatpush.bf16.msrb.mxu1 %v581_v6 }
 0x128   : > { %v448_v36 = vpop.xlane.xlu1 %447  ;;  %v445_v37 = vpop.xlane.xlu0 %444 }
 0x129   : > { %v464_v39 = vsub.f32 %v430_v8, %v448_v36  ;;  %v463_v40 = vsub.f32 %v429_v9, %v445_v37 }
 0x12b   : > { %v979_v41 = vpop.eup %860  ;;  %v475_v42 = vmul.f32 1.442695, %v464_v39  ;;  %v473_v43 = vmul.f32 1.442695, %v463_v40 }
 0x12c   : > { %v981_v44 = vpop.eup %862  ;;  %v506_v45 = vsel %vm439_vm4, %v979_v41, 0.0 }
 0x12d   : > { %864 = vpow2.f32 %v475_v42  ;;  %v500_v47 = vsel %vm439_vm4, %v981_v44, 0.0  ;;  %489 = vadd.xlane.f32.xlu1 %v488_v46 }
 0x12e   : > { %866 = vpow2.f32 %v473_v43  ;;  %507 = vadd.xlane.f32.xlu2 %v506_v45  ;;  %501 = vadd.xlane.f32.xlu0 %v500_v47 }
 0x133   : > { %v989_v48 = vpop.eup %864 }
 0x134   : > { %v991_v49 = vpop.eup %866  ;;  %v494_v50 = vsel %vm439_vm4, %v989_v48, 0.0 }
 0x135   : > { %v491_v51 = vsel %vm435_vm2, %v991_v49, 0.0 }
 0x136   : > { %492 = vadd.xlane.f32.xlu2 %v491_v51  ;;  %495 = vadd.xlane.f32.xlu0 %v494_v50 }
 0x191   : > { %v487_v7 = vpop.xlane.xlu0 %486 }
 0x192   : > { %868 = vrcp.f32 %v487_v7 }
 0x198   : > { %v505_v8 = vpop.xlane.xlu1 %504  ;;  %v869_v11 = vpop.eup %868 }
 0x199   : > { %v499_v9 = vpop.xlane.xlu2 %498  ;;  %v517_v16 = vmul.f32 %v869_v11, %v965_v23 }
 0x19a   : > { %870 = vrcp.f32 %v499_v9 }
 0x19b   : > { %872 = vrcp.f32 %v505_v8  ;;  %v525_v21 = vpack.c.bf16 %v517_v16, %v517_v16 }
 0x1a0   : > { %v490_v10 = vpop.xlane.xlu1 %489  ;;  %v871_v14 = vpop.eup %870 }
 0x1a1   : > { %v502_v12 = vpop.xlane.xlu0 %501  ;;  %874 = vrcp.f32 %v490_v10  ;;  %v508_v13 = vpop.xlane.xlu2 %507  ;;  %v521_v17 = vmul.f32 %v871_v14, %v971_v33  ;;  %v535_v33 = vunpack.c.l.b16 %v525_v21 }
 0x1a2   : > { %876 = vrcp.f32 %v502_v12  ;;  %v873_v15 = vpop.eup %872 }
 0x1a3   : > { %878 = vrcp.f32 %v508_v13  ;;  %v523_v18 = vmul.f32 %v873_v15, %v969_v30  ;;  %v529_v25 = vpack.c.bf16 %v521_v17, %v521_v17 }
 0x1a5   : > { %v531_v29 = vpack.c.bf16 %v523_v18, %v523_v18  ;;  %v599_v35 = vunpack.c.l.b16 %v529_v25 }
 0x1a7   : > { %v875_v19 = vpop.eup %874  ;;  %v629_v37 = vunpack.c.l.b16 %v531_v29 }
 0x1a8   : > { %v877_v20 = vpop.eup %876  ;;  %v518_v22 = vmul.f32 %v875_v19, %v977_v38 }
 0x1a9   : > { %v879_v24 = vpop.eup %878  ;;  %v522_v26 = vmul.f32 %v877_v20, %v981_v44  ;;  %v496_v27 = vpop.xlane.xlu0 %495 }
 0x1aa   : > { %v493_v28 = vpop.xlane.xlu2 %492  ;;  %v526_v31 = vpack.c.bf16 %v518_v22, %v518_v22  ;;  %v524_v32 = vmul.f32 %v879_v24, %v979_v41  ;;  %880 = vrcp.f32 %v496_v27 }
 0x1ab   : > { %v530_v23 = vpack.c.bf16 %v522_v26, %v522_v26  ;;  %882 = vrcp.f32 %v493_v28 }
 0x1ac   : > { %v536_v30 = vunpack.c.l.b16 %v526_v31  ;;  %v532_v34 = vpack.c.bf16 %v524_v32, %v524_v32 }
 0x1ad   : > { %v600_v36 = vunpack.c.l.b16 %v530_v23 }
 0x1ae   : > { %v630_v38 = vunpack.c.l.b16 %v532_v34  ;;  %v537_v39 = vpack.c.b16 %v536_v30, %v535_v33 }
 0x1af   : > { %v601_v40 = vpack.c.b16 %v600_v36, %v599_v35 }
 0x1b0   : > { %v881_v42 = vpop.eup %880  ;;  %807 = vmatmul.msk.bf16.vlgmr.msrb.gmra.mxu0 %vm435_vm2, %v537_v39  ;;  %v631_v43 = vpack.c.b16 %v630_v38, %v629_v37 }
 0x1b1   : > { %v883_v44 = vpop.eup %882  ;;  %v520_v41 = vmul.f32 %v881_v42, %v989_v48  ;;  %817 = vmatmul.msk.bf16.vlgmr.msrb.gmra.mxu2 %vm435_vm2, %v601_v40 }
 0x1b2   : > { %v519_v45 = vmul.f32 %v883_v44, %v991_v49  ;;  %822 = vmatmul.msk.bf16.vlgmr.msrb.gmra.mxu3 %vm435_vm2, %v631_v43 }
 0x1b3   : > { %v528_v46 = vpack.c.bf16 %v520_v41, %v520_v41 }
 0x1b4   : > { %v527_v47 = vpack.c.bf16 %v519_v45, %v519_v45 }
 0x1b5   : > { %v570_v50 = vunpack.c.l.b16 %v528_v46 }
 0x1b6   : > { %v569_v51 = vunpack.c.l.b16 %v527_v47 }
 0x1b8   : > { %v571_v52 = vpack.c.b16 %v570_v50, %v569_v51 }
 0x1ba   : > { %812 = vmatmul.msk.bf16.vlgmr.msrb.gmra.mxu1 %vm435_vm2, %v571_v52 }
 0x22d   : > { %v562_v53 = vpop.f32.mrf.mxu0 }
 0x22e   : > { %657 = vst.msk [vmem:[%s251_s9] sm:$0xff] %vm287_vm0, %v562_v53 }
 0x234   : > { %v622_v48 = vpop.f32.mrf.mxu2 }
 0x235   : > { %662 = vst.msk [vmem:[%s251_s9 + $0x20] sm:$0xff] %vm287_vm0, %v622_v48  ;;  %v652_v49 = vpop.f32.mrf.mxu3  ;;  %v564_v54 = vpop.f32.mrf.mxu0 }
 0x236   : > { %664 = vst.msk [vmem:[%s251_s9 + $0x30] sm:$0xff] %vm287_vm0, %v652_v49 }
 0x237   : > { %659 = vst.msk [vmem:[%s251_s9 + $0x8] sm:$0x1] %vm658_vm7, %v564_v54  ;;  %v592_v55 = vpop.f32.mrf.mxu1 }
 0x238   : > { %660 = vst.msk [vmem:[%s251_s9 + $0x10] sm:$0xff] %vm287_vm0, %v592_v55 }
 0x23c   : > { %v624_v56 = vpop.f32.mrf.mxu2 }
 0x23d   : > { %663 = vst.msk [vmem:[%s251_s9 + $0x28] sm:$0x1] %vm658_vm7, %v624_v56  ;;  %v654_v57 = vpop.f32.mrf.mxu3 }
 0x23e   : > { %665 = vst.msk [vmem:[%s251_s9 + $0x38] sm:$0x1] %vm658_vm7, %v654_v57 }
 0x23f   : > { %v594_v58 = vpop.f32.mrf.mxu1 }
 0x240   : > { %661 = vst.msk [vmem:[%s251_s9 + $0x18] sm:$0x1] %vm658_vm7, %v594_v58 }
 0x241 PF: > { %s14_s15 = sadd.s32 1, %s890_s15  }
 0x242   : > { %p11_p4 = scmp.ge.s32.totalorder %s14_s15, 4  }
 0x244   :  { %13 = sbr.rel (!%p11_p4) target bundleno = 1 (0x1), region = 75 }

// kernel: forward.23
= control target key start
LH: loop header
LB: loop body
LE: loop exit
PB: predicated region body
PF: predicated region fallthrough
CT: control target
= control target key end

     0   :  { %s264_s1 = inlined_call_operand.vmem [shape: bf16[128,128], index: 1, kind: input, shape index: {}]   ;;  %s265_s2 = inlined_call_operand.vmem [shape: f32[1,128], index: 2, kind: input, shape index: {}]   ;;  %s266_s0 = inlined_call_operand.vmem [shape: bf16[24,128], index: 0, kind: input, shape index: {}]   ;;  %s267_s3 = inlined_call_operand.vmem [shape: f32[24,128], index: 3, kind: output, shape index: {}]  }
   0x1   :  { %v192_v0 = vld [vmem:[%s264_s1 + $0x38] sm:$0xff]  ;;  %v191_v1 = vld [vmem:[%s264_s1 + $0x30] sm:$0xff]  ;;  %v190_v2 = vld [vmem:[%s264_s1 + $0x28] sm:$0xff] }
   0x2   :  { %101 = vmatpush.bf16.msra.mxu0 %v192_v0  ;;  %193 = vmatpush.bf16.msra.mxu1 %v192_v0  ;;  %v189_v3 = vld [vmem:[%s264_s1 + $0x20] sm:$0xff]  ;;  %v188_v4 = vld [vmem:[%s264_s1 + $0x18] sm:$0xff]  ;;  %v187_v5 = vld [vmem:[%s264_s1 + $0x10] sm:$0xff] }
   0x3   :  { %v186_v6 = vld [vmem:[%s264_s1 + $0x8] sm:$0xff]  ;;  %v185_v9 = vld [vmem:[%s264_s1] sm:$0xff] }
   0x4   :  { %v26_v7 = vld [vmem:[%s266_s0 + $0x8] sm:$0xf]  ;;  %v184_v10 = vld [vmem:[%s266_s0] sm:$0xff] }
   0x5   :  { %v48_v8 = vunpack.c.l.b16 %v26_v7  ;;  %v201_v12 = vld [vmem:[%s265_s2] ss:$0 sm:$0xff] }
   0x6   :  { %102 = vmatpush.bf16.msra.mxu0 %v191_v1  ;;  %194 = vmatpush.bf16.msra.mxu1 %v191_v1 }
   0x7   :  { %v50_v11 = vpack.c.b16 %v48_v8, %v48_v8 }
   0xa   :  { %103 = vmatpush.bf16.msra.mxu0 %v190_v2  ;;  %195 = vmatpush.bf16.msra.mxu1 %v190_v2 }
   0xe   :  { %104 = vmatpush.bf16.msra.mxu0 %v189_v3  ;;  %196 = vmatpush.bf16.msra.mxu1 %v189_v3 }
  0x12   :  { %105 = vmatpush.bf16.msra.mxu0 %v188_v4  ;;  %197 = vmatpush.bf16.msra.mxu1 %v188_v4 }
  0x16   :  { %106 = vmatpush.bf16.msra.mxu0 %v187_v5  ;;  %198 = vmatpush.bf16.msra.mxu1 %v187_v5 }
  0x1a   :  { %107 = vmatpush.bf16.msra.mxu0 %v186_v6  ;;  %199 = vmatpush.bf16.msra.mxu1 %v186_v6 }
  0x1e   :  { %108 = vmatpush.bf16.msra.mxu0 %v185_v9  ;;  %200 = vmatpush.bf16.msra.mxu1 %v185_v9 }
  0x21   :  { %109 = vmatmul.bf16.vlgmr.msra.gmra.mxu0 %v184_v10  ;;  %114 = vmatmul.bf16.vlgmr.msra.gmra.mxu1 %v50_v11 }
  0x9e   :  { %v110_v13 = vpop.f32.mrf.mxu0  ;;  %v115_v14 = vpop.f32.mrf.mxu1 }
  0x9f   :  { %v135_v15 = vadd.f32 %v201_v12, %v110_v13  ;;  %v137_v16 = vadd.f32 %v201_v12, %v115_v14 }
  0xa1   :  { %v138_v17 = vmax.f32 %v135_v15, 0.0  ;;  %v140_v18 = vmax.f32 %v137_v16, 0.0 }
  0xa3   :  { %141 = vst [vmem:[%s267_s3] sm:$0xff] %v138_v17 }
  0xa4   :  { %143 = vst [vmem:[%s267_s3 + $0x10] sm:$0xff] %v140_v18 }
  0xa6   :  { %v112_v19 = vpop.f32.mrf.mxu0  ;;  %v117_v20 = vpop.f32.mrf.mxu1 }
  0xa7   :  { %v136_v21 = vadd.f32 %v201_v12, %v112_v19 }
  0xa9   :  { %v139_v22 = vmax.f32 %v136_v21, 0.0 }
  0xab   :  { %142 = vst [vmem:[%s267_s3 + $0x8] sm:$0xff] %v139_v22 }

</bundles_post_ra>
